<compile_context>
chip_gen: v7x
topology: tpu7x:2x2x1
jax: 0.10.0
libtpu: 0.0.40
codegen_flags: <defaults>
</compile_context>

<pallas_src>
import functools
import math

import jax
import jax.numpy as jnp
from jax.experimental import pallas as pl
from jax.experimental.pallas import tpu as pltpu


# ---------------------------------------------------------------------------
# In-kernel helpers
# ---------------------------------------------------------------------------
def _layernorm(x, gamma, beta, eps=1e-5):
    # x: (R, D) f32; gamma, beta: (D,) f32  -- matches torch.nn.LayerNorm(dim)
    mu = jnp.mean(x, axis=-1, keepdims=True)
    var = jnp.mean((x - mu) ** 2, axis=-1, keepdims=True)
    return (x - mu) * jax.lax.rsqrt(var + eps) * gamma + beta


def _gelu_exact(x):
    # torch.nn.GELU() default = exact erf formulation
    return 0.5 * x * (1.0 + jax.lax.erf(x * (1.0 / math.sqrt(2.0))))


# ---------------------------------------------------------------------------
# Fused kernel: all transformer layers + final LayerNorm
# grid = (row_tiles, depth); residual stream resident in VMEM scratch per row tile.
# ---------------------------------------------------------------------------
def fused_transformer_kernel(
    x_ref,       # (rows, D)            input tokens for this row tile (f32)
    wq_ref,      # (1, H, D, dh)        bf16, head-major, pre-transposed
    wk_ref,      # (1, H, D, dh)        bf16
    wv_ref,      # (1, H, D, dh)        bf16
    wo_ref,      # (1, H, dh, D)        bf16
    w1_ref,      # (1, D, mlp)          bf16
    w2_ref,      # (1, mlp, D)          bf16
    vecs_ref,    # (1, 8, D)  f32       rows: ln1g, ln1b, attn_out_bias, ln2g, ln2b, ff2_bias, 0, 0
    b1_ref,      # (1, 1, mlp) f32      ff1 bias
    lnf_ref,     # (2, D)     f32       final LayerNorm gamma/beta (grid-invariant)
    o_ref,       # (rows, D)            written only on the last depth step
    acc_ref,     # VMEM scratch (rows, D) f32 -- residual stream (resident across depth)
    *,
    bt, n, heads, dim_head,
):
    d = pl.program_id(1)
    rows = bt * n
    scale = dim_head ** (-0.5)

    @pl.when(d == 0)
    def _():
        acc_ref[...] = x_ref[...].astype(jnp.float32)

    x = acc_ref[...]                                   # (rows, D) f32
    vecs = vecs_ref[0]                                 # (8, D) f32

    # ---------------- Attention ----------------
    h = _layernorm(x, vecs[0], vecs[1])                # (rows, D) f32
    hb = jnp.broadcast_to(h.astype(jnp.bfloat16), (heads, rows, h.shape[-1]))

    # Head-batched Q/K/V from pre-split weights: one batched einsum each, no per-head
    # lane slicing, no transposes (head axis is the leading batch dim throughout).
    q = jnp.einsum("hrd,hde->hre", hb, wq_ref[0], preferred_element_type=jnp.float32)
    k = jnp.einsum("hrd,hde->hre", hb, wk_ref[0], preferred_element_type=jnp.float32)
    v = jnp.einsum("hrd,hde->hre", hb, wv_ref[0], preferred_element_type=jnp.float32)

    # (H, bt*n, dh) -> (H*bt, n, dh): pure leading-dim reshape (flat order preserved).
    q = (q * scale).reshape(heads * bt, n, dim_head).astype(jnp.bfloat16)
    k = k.reshape(heads * bt, n, dim_head).astype(jnp.bfloat16)
    v = v.reshape(heads * bt, n, dim_head).astype(jnp.bfloat16)

    dots = jnp.einsum("znd,zmd->znm", q, k, preferred_element_type=jnp.float32)
    dots = dots - jnp.max(dots, axis=-1, keepdims=True)
    p = jnp.exp(dots)
    p = p * pl.reciprocal(jnp.sum(p, axis=-1, keepdims=True), approx=True)

    o_h = jnp.einsum("znm,zmd->znd", p.astype(jnp.bfloat16), v,
                     preferred_element_type=jnp.float32)           # (H*bt, n, dh)
    o_h = o_h.reshape(heads, rows, dim_head).astype(jnp.bfloat16)  # (H, rows, dh)

    # Per-head projection, accumulated into a lane-dense (rows, D) value
    # (no (rows, inner) scratch, no masked dh-wide stores).
    proj_h = jnp.einsum("hre,heo->hro", o_h, wo_ref[0],
                        preferred_element_type=jnp.float32)        # (H, rows, D)
    proj = proj_h[0]
    for hh in range(1, heads):
        proj = proj + proj_h[hh]
    x = x + proj + vecs[2]                                         # residual + out bias

    # ---------------- FeedForward ----------------
    h2 = _layernorm(x, vecs[3], vecs[4]).astype(jnp.bfloat16)
    a = jnp.dot(h2, w1_ref[0], preferred_element_type=jnp.float32) + b1_ref[0, 0]
    a = _gelu_exact(a).astype(jnp.bfloat16)
    ff = jnp.dot(a, w2_ref[0], preferred_element_type=jnp.float32) + vecs[5]
    x = x + ff                                                     # residual

    acc_ref[...] = x

    @pl.when(d == pl.num_programs(1) - 1)
    def _():
        o_ref[...] = _layernorm(x, lnf_ref[0], lnf_ref[1]).astype(o_ref.dtype)


# ---------------------------------------------------------------------------
# One-time weight packing (hoisted out of the forward pass)
# ---------------------------------------------------------------------------
def pack_params(layer_params, final_gamma, final_beta, heads, dim_head):
    # TODO(synk): the heads==1 and dim_head==dim "Identity projection" branch of the
    # PyTorch module is not modeled (projection weights are always expected).
    D = layer_params[0][0].shape[-1]

    wq, wk, wv, wo, w1, w2, vecs, b1s = [], [], [], [], [], [], [], []
    for (ln1g, ln1b, wqkv, wout, bout, ln2g, ln2b, w1_, b1_, w2_, b2_) in layer_params:
        # torch to_qkv: (3*inner, D); columns of x @ wqkv.T ordered [q|k|v], head-major.
        qkvT = wqkv.T.reshape(D, 3, heads, dim_head)           # (D, 3, H, dh)
        wq.append(jnp.transpose(qkvT[:, 0], (1, 0, 2)))        # (H, D, dh)
        wk.append(jnp.transpose(qkvT[:, 1], (1, 0, 2)))
        wv.append(jnp.transpose(qkvT[:, 2], (1, 0, 2)))
        wo.append(wout.T.reshape(heads, dim_head, D))          # (H, dh, D)
        w1.append(w1_.T)                                       # (D, mlp)
        w2.append(w2_.T)                                       # (mlp, D)
        zero = jnp.zeros((D,), jnp.float32)
        vecs.append(jnp.stack([ln1g[0], ln1b[0], bout[0],
                               ln2g[0], ln2b[0], b2_[0], zero, zero]))   # (8, D)
        b1s.append(b1_)                                        # (1, mlp)

    return dict(
        wq=jnp.stack(wq).astype(jnp.bfloat16),     # (depth, H, D, dh)
        wk=jnp.stack(wk).astype(jnp.bfloat16),
        wv=jnp.stack(wv).astype(jnp.bfloat16),
        wo=jnp.stack(wo).astype(jnp.bfloat16),     # (depth, H, dh, D)
        w1=jnp.stack(w1).astype(jnp.bfloat16),     # (depth, D, mlp)
        w2=jnp.stack(w2).astype(jnp.bfloat16),     # (depth, mlp, D)
        vecs=jnp.stack(vecs).astype(jnp.float32),  # (depth, 8, D)
        b1=jnp.stack(b1s).astype(jnp.float32),     # (depth, 1, mlp)
        lnf=jnp.concatenate([final_gamma, final_beta], axis=0).astype(jnp.float32),  # (2, D)
    )


# ---------------------------------------------------------------------------
# Wrapper: single fused pallas_call
# ---------------------------------------------------------------------------
def transformer_forward(x, packed, heads, dim_head, *, batch_tile=1, weight_buffers=2):
    B, N, D = x.shape
    depth = packed["wq"].shape[0]
    assert B % batch_tile == 0
    bt = batch_tile
    rows = bt * N
    x2 = x.reshape(B * N, D)

    def wspec(arr):
        nd = arr.ndim
        blk = (1,) + arr.shape[1:]
        imap = lambda i, d, _n=nd: (d,) + (0,) * (_n - 1)
        if weight_buffers != 2:          # e.g. 3 on v5e to hide exposed weight DMA
            return pl.BlockSpec(blk, imap, pipeline_mode=pl.Buffered(weight_buffers))
        return pl.BlockSpec(blk, imap)

    in_specs = [
        pl.BlockSpec((rows, D), lambda i, d: (i, 0)),          # x (row tile, depth-invariant)
        wspec(packed["wq"]), wspec(packed["wk"]), wspec(packed["wv"]),
        wspec(packed["wo"]), wspec(packed["w1"]), wspec(packed["w2"]),
        wspec(packed["vecs"]), wspec(packed["b1"]),
        pl.BlockSpec((2, D), lambda i, d: (0, 0)),             # final LayerNorm params
    ]
    out_spec = pl.BlockSpec((rows, D), lambda i, d: (i, 0))

    # Explicit VMEM budget from the (lane/sublane padded) block footprint + headroom.
    def blk_bytes(shape, dtype):
        s = list(shape)
        s[-1] = max(-(-s[-1] // 128) * 128, 128)
        if len(s) >= 2:
            s[-2] = -(-s[-2] // 8) * 8
        tot = 1
        for v in s:
            tot *= v
        return tot * jnp.dtype(dtype).itemsize

    streamed = sum(blk_bytes((1,) + packed[k].shape[1:], packed[k].dtype)
                   for k in ("wq", "wk", "wv", "wo", "w1", "w2", "vecs", "b1"))
    resident = (2 * blk_bytes((rows, D), x.dtype)          # input double buffer
                + 2 * blk_bytes((rows, D), x.dtype)        # output double buffer
                + 2 * blk_bytes((2, D), jnp.float32)       # final LN params
                + blk_bytes((rows, D), jnp.float32))       # residual scratch
    vmem_limit = int(min(max(3 * streamed + resident + (8 << 20), 32 << 20), 100 << 20))

    kernel = functools.partial(fused_transformer_kernel,
                               bt=bt, n=N, heads=heads, dim_head=dim_head)

    out2 = pl.pallas_call(
        kernel,
        out_shape=jax.ShapeDtypeStruct((B * N, D), x.dtype),
        grid_spec=pltpu.PrefetchScalarGridSpec(
            num_scalar_prefetch=0,
            grid=(B // bt, depth),             # depth LAST -> residual stays resident
            in_specs=in_specs,
            out_specs=out_spec,
            scratch_shapes=[pltpu.VMEM((rows, D), jnp.float32)],   # residual stream
        ),
        compiler_params=pltpu.CompilerParams(
            dimension_semantics=("parallel", "arbitrary"),
            vmem_limit_bytes=vmem_limit),
    )(x2, packed["wq"], packed["wk"], packed["wv"], packed["wo"],
      packed["w1"], packed["w2"], packed["vecs"], packed["b1"], packed["lnf"])

    return out2.reshape(B, N, D)


# ---------------------------------------------------------------------------
# Pure-JAX reference (correctness check against the Pallas kernel)
# ---------------------------------------------------------------------------
def _ref_forward(x, layer_params, final_gamma, final_beta, heads, dim_head):
    def ln(t, g, b):
        mu = jnp.mean(t, axis=-1, keepdims=True)
        var = jnp.mean((t - mu) ** 2, axis=-1, keepdims=True)
        return (t - mu) / jnp.sqrt(var + 1e-5) * g[0] + b[0]

    inner = heads * dim_head
    scale = dim_head ** (-0.5)
    for (ln1g, ln1b, wqkv, wout, bout, ln2g, ln2b, w1, b1, w2, b2) in layer_params:
        h = ln(x, ln1g, ln1b)
        qkv = h @ wqkv.T
        q, k, v = jnp.split(qkv, 3, axis=-1)
        B, N, _ = x.shape
        q = q.reshape(B, N, heads, dim_head).transpose(0, 2, 1, 3)
        k = k.reshape(B, N, heads, dim_head).transpose(0, 2, 1, 3)
        v = v.reshape(B, N, heads, dim_head).transpose(0, 2, 1, 3)
        dots = jnp.einsum("bhnd,bhmd->bhnm", q, k) * scale
        attn = jax.nn.softmax(dots, axis=-1)
        out = jnp.einsum("bhnm,bhmd->bhnd", attn, v)
        out = out.transpose(0, 2, 1, 3).reshape(B, N, inner)
        x = x + (out @ wout.T + bout[0])
        h2 = ln(x, ln2g, ln2b)
        a = jax.nn.gelu(h2 @ w1.T + b1[0], approximate=False)
        x = x + (a @ w2.T + b2[0])
    return ln(x, final_gamma, final_beta)


# ---------------------------------------------------------------------------
# Parameter init + main
# ---------------------------------------------------------------------------
def init_params(key, dim, depth, heads, dim_head, mlp_dim):
    inner = heads * dim_head
    layer_params = []
    for _ in range(depth):
        key, *ks = jax.random.split(key, 5)
        ln1g = jnp.ones((1, dim), jnp.float32)
        ln1b = jnp.zeros((1, dim), jnp.float32)
        wqkv = 0.05 * jax.random.normal(ks[0], (3 * inner, dim), jnp.float32)
        wout = 0.05 * jax.random.normal(ks[1], (dim, inner), jnp.float32)
        bout = jnp.zeros((1, dim), jnp.float32)
        ln2g = jnp.ones((1, dim), jnp.float32)
        ln2b = jnp.zeros((1, dim), jnp.float32)
        w1 = 0.05 * jax.random.normal(ks[2], (mlp_dim, dim), jnp.float32)
        b1 = jnp.zeros((1, mlp_dim), jnp.float32)
        w2 = 0.05 * jax.random.normal(ks[3], (dim, mlp_dim), jnp.float32)
        b2 = jnp.zeros((1, dim), jnp.float32)
        layer_params.append((ln1g, ln1b, wqkv, wout, bout, ln2g, ln2b, w1, b1, w2, b2))
    final_gamma = jnp.ones((1, dim), jnp.float32)
    final_beta = jnp.zeros((1, dim), jnp.float32)
    return layer_params, final_gamma, final_beta


if __name__ == "__main__":
    # Small shapes consistent with the module's forward: x is (batch, seq, dim)
    B, N, dim = 2, 8, 32
    depth, heads, dim_head, mlp_dim = 2, 4, 8, 64

    key = jax.random.PRNGKey(0)
    key, xk, pk = jax.random.split(key, 3)
    x = jax.random.normal(xk, (B, N, dim), jnp.float32)

    layer_params, fg, fb = init_params(pk, dim, depth, heads, dim_head, mlp_dim)

    # Pack (transpose / head-split / bf16-cast) ONCE, outside the forward pass.
    packed = pack_params(layer_params, fg, fb, heads, dim_head)

    out = transformer_forward(x, packed, heads, dim_head, batch_tile=1)
    out = jax.block_until_ready(out)

    ref = _ref_forward(x, layer_params, fg, fb, heads, dim_head)
    assert out.shape == (B, N, dim)
    # Tolerance accounts for bf16 matmul inputs (weights + activations) and the
    # EUP approximate reciprocal in the softmax denominator; statistics stay f32.
    assert jnp.allclose(out, ref, rtol=3e-2, atol=3e-2), "Pallas output mismatch vs reference"

    print("KERNEL_OK")
</pallas_src>

<mosaic_0001>
module attributes {stable_mosaic.version = 11 : i64} {
  func.func @fused_transformer_kernel(%arg0: i32, %arg1: i32, %arg2: memref<8x32xf32, #tpu.memory_space<vmem>>, %arg3: memref<1x4x32x8xbf16, #tpu.memory_space<vmem>>, %arg4: memref<1x4x32x8xbf16, #tpu.memory_space<vmem>>, %arg5: memref<1x4x32x8xbf16, #tpu.memory_space<vmem>>, %arg6: memref<1x4x8x32xbf16, #tpu.memory_space<vmem>>, %arg7: memref<1x32x64xbf16, #tpu.memory_space<vmem>>, %arg8: memref<1x64x32xbf16, #tpu.memory_space<vmem>>, %arg9: memref<1x8x32xf32, #tpu.memory_space<vmem>>, %arg10: memref<1x1x64xf32, #tpu.memory_space<vmem>>, %arg11: memref<2x32xf32, #tpu.memory_space<vmem>>, %arg12: memref<8x32xf32, #tpu.memory_space<vmem>>, %arg13: memref<8x32xf32, #tpu.memory_space<vmem>>) attributes {dimension_semantics = [#tpu.dimension_semantics<parallel>, #tpu.dimension_semantics<arbitrary>], iteration_bounds = array<i64: 2, 2>, scalar_prefetch = 0 : i64, scratch_operands = 1 : i64, tpu.core_type = #tpu.core_type<tc>, window_params = [{transform_indices = @transform_0, window_bounds = array<i64: 8, 32>}, {transform_indices = @transform_1, window_bounds = array<i64: 1, 4, 32, 8>}, {transform_indices = @transform_2, window_bounds = array<i64: 1, 4, 32, 8>}, {transform_indices = @transform_3, window_bounds = array<i64: 1, 4, 32, 8>}, {transform_indices = @transform_4, window_bounds = array<i64: 1, 4, 8, 32>}, {transform_indices = @transform_5, window_bounds = array<i64: 1, 32, 64>}, {transform_indices = @transform_6, window_bounds = array<i64: 1, 64, 32>}, {transform_indices = @transform_7, window_bounds = array<i64: 1, 8, 32>}, {transform_indices = @transform_8, window_bounds = array<i64: 1, 1, 64>}, {pipeline_mode = #tpu.pipeline_mode<synchronous>, transform_indices = @transform_9, window_bounds = array<i64: 2, 32>}, {transform_indices = @transform_10, window_bounds = array<i64: 8, 32>}]} {
    %c0_i32 = arith.constant 0 : i32
    %0 = arith.cmpi eq, %arg1, %c0_i32 : i32
    %1 = arith.extui %0 : i1 to i32
    %c0_i32_0 = arith.constant 0 : i32
    %2 = arith.cmpi ne, %1, %c0_i32_0 : i32
    scf.if %2 {
      %c0_56 = arith.constant 0 : index
      %c0_57 = arith.constant 0 : index
      %144 = vector.load %arg2[%c0_56, %c0_57] : memref<8x32xf32, #tpu.memory_space<vmem>>, vector<8x32xf32>
      %c0_58 = arith.constant 0 : index
      %c0_59 = arith.constant 0 : index
      %145 = vector.load %arg13[%c0_58, %c0_59] : memref<8x32xf32, #tpu.memory_space<vmem>>, vector<8x32xf32>
      tpu.vector_store %arg13[%c0_58, %c0_59], %144 {strides = array<i32>} : memref<8x32xf32, #tpu.memory_space<vmem>>, vector<8x32xf32>,
    } else {
    }
    %c0 = arith.constant 0 : index
    %c0_1 = arith.constant 0 : index
    %3 = vector.load %arg13[%c0, %c0_1] : memref<8x32xf32, #tpu.memory_space<vmem>>, vector<8x32xf32>
    %c0_2 = arith.constant 0 : index
    %c0_3 = arith.constant 0 : index
    %c0_4 = arith.constant 0 : index
    %4 = vector.load %arg9[%c0_2, %c0_3, %c0_4] : memref<1x8x32xf32, #tpu.memory_space<vmem>>, vector<1x8x32xf32>
    %5 = vector.shape_cast %4 : vector<1x8x32xf32> to vector<8x32xf32>
    %6 = vector.extract_strided_slice %5 {offsets = [0, 0], sizes = [1, 32], strides = [1, 1]} : vector<8x32xf32> to vector<1x32xf32>
    %7 = vector.shape_cast %6 : vector<1x32xf32> to vector<32xf32>
    %8 = vector.extract_strided_slice %5 {offsets = [1, 0], sizes = [1, 32], strides = [1, 1]} : vector<8x32xf32> to vector<1x32xf32>
    %9 = vector.shape_cast %8 : vector<1x32xf32> to vector<32xf32>
    %cst = arith.constant dense<0.000000e+00> : vector<8xf32>
    %10 = vector.multi_reduction <add>, %3, %cst [1] : vector<8x32xf32> to vector<8xf32>
    %11 = vector.shape_cast %10 : vector<8xf32> to vector<8x1xf32>
    %cst_5 = arith.constant 3.200000e+01 : f32
    %12 = vector.broadcast %cst_5 : f32 to vector<8x1xf32>
    %13 = arith.divf %11, %12 : vector<8x1xf32>
    %14 = vector.broadcast %13 : vector<8x1xf32> to vector<8x32xf32>
    %15 = arith.subf %3, %14 : vector<8x32xf32>
    %16 = arith.mulf %15, %15 : vector<8x32xf32>
    %cst_6 = arith.constant dense<0.000000e+00> : vector<8xf32>
    %17 = vector.multi_reduction <add>, %16, %cst_6 [1] : vector<8x32xf32> to vector<8xf32>
    %18 = vector.shape_cast %17 : vector<8xf32> to vector<8x1xf32>
    %cst_7 = arith.constant 3.200000e+01 : f32
    %19 = vector.broadcast %cst_7 : f32 to vector<8x1xf32>
    %20 = arith.divf %18, %19 : vector<8x1xf32>
    %21 = vector.broadcast %13 : vector<8x1xf32> to vector<8x32xf32>
    %22 = arith.subf %3, %21 : vector<8x32xf32>
    %cst_8 = arith.constant 9.99999974E-6 : f32
    %23 = vector.broadcast %cst_8 : f32 to vector<8x1xf32>
    %24 = arith.addf %20, %23 : vector<8x1xf32>
    %25 = math.rsqrt %24 : vector<8x1xf32>
    %26 = vector.broadcast %25 : vector<8x1xf32> to vector<8x32xf32>
    %27 = arith.mulf %22, %26 : vector<8x32xf32>
    %28 = vector.shape_cast %7 : vector<32xf32> to vector<1x32xf32>
    %29 = vector.broadcast %28 : vector<1x32xf32> to vector<8x32xf32>
    %30 = arith.mulf %27, %29 : vector<8x32xf32>
    %31 = vector.shape_cast %9 : vector<32xf32> to vector<1x32xf32>
    %32 = vector.broadcast %31 : vector<1x32xf32> to vector<8x32xf32>
    %33 = arith.addf %30, %32 : vector<8x32xf32>
    %34 = arith.truncf %33 : vector<8x32xf32> to vector<8x32xbf16>
    %35 = vector.shape_cast %34 : vector<8x32xbf16> to vector<1x8x32xbf16>
    %36 = vector.broadcast %35 : vector<1x8x32xbf16> to vector<4x8x32xbf16>
    %c0_9 = arith.constant 0 : index
    %c0_10 = arith.constant 0 : index
    %c0_11 = arith.constant 0 : index
    %c0_12 = arith.constant 0 : index
    %37 = vector.load %arg3[%c0_9, %c0_10, %c0_11, %c0_12] : memref<1x4x32x8xbf16, #tpu.memory_space<vmem>>, vector<1x4x32x8xbf16>
    %38 = vector.shape_cast %37 : vector<1x4x32x8xbf16> to vector<4x32x8xbf16>
    "tpu.trace_start"() <{level = 10 : i32, message = "hrd,hde->hre"}> : () -> ()
    %cst_13 = arith.constant dense<0.000000e+00> : vector<4x8x8xf32>
    %39 = tpu.matmul %36, %38, %cst_13 {dimension_numbers = #tpu.dot_dimension_numbers<[2], [1], [1], [2], [0, 0, 0, 1, 1, 2], [0], [0]>} : vector<4x8x32xbf16>, vector<4x32x8xbf16>, vector<4x8x8xf32> -> vector<4x8x8xf32>
    "tpu.trace_stop"() : () -> ()
    %c0_14 = arith.constant 0 : index
    %c0_15 = arith.constant 0 : index
    %c0_16 = arith.constant 0 : index
    %c0_17 = arith.constant 0 : index
    %40 = vector.load %arg4[%c0_14, %c0_15, %c0_16, %c0_17] : memref<1x4x32x8xbf16, #tpu.memory_space<vmem>>, vector<1x4x32x8xbf16>
    %41 = vector.shape_cast %40 : vector<1x4x32x8xbf16> to vector<4x32x8xbf16>
    "tpu.trace_start"() <{level = 10 : i32, message = "hrd,hde->hre"}> : () -> ()
    %cst_18 = arith.constant dense<0.000000e+00> : vector<4x8x8xf32>
    %42 = tpu.matmul %36, %41, %cst_18 {dimension_numbers = #tpu.dot_dimension_numbers<[2], [1], [1], [2], [0, 0, 0, 1, 1, 2], [0], [0]>} : vector<4x8x32xbf16>, vector<4x32x8xbf16>, vector<4x8x8xf32> -> vector<4x8x8xf32>
    "tpu.trace_stop"() : () -> ()
    %c0_19 = arith.constant 0 : index
    %c0_20 = arith.constant 0 : index
    %c0_21 = arith.constant 0 : index
    %c0_22 = arith.constant 0 : index
    %43 = vector.load %arg5[%c0_19, %c0_20, %c0_21, %c0_22] : memref<1x4x32x8xbf16, #tpu.memory_space<vmem>>, vector<1x4x32x8xbf16>
    %44 = vector.shape_cast %43 : vector<1x4x32x8xbf16> to vector<4x32x8xbf16>
    "tpu.trace_start"() <{level = 10 : i32, message = "hrd,hde->hre"}> : () -> ()
    %cst_23 = arith.constant dense<0.000000e+00> : vector<4x8x8xf32>
    %45 = tpu.matmul %36, %44, %cst_23 {dimension_numbers = #tpu.dot_dimension_numbers<[2], [1], [1], [2], [0, 0, 0, 1, 1, 2], [0], [0]>} : vector<4x8x32xbf16>, vector<4x32x8xbf16>, vector<4x8x8xf32> -> vector<4x8x8xf32>
    "tpu.trace_stop"() : () -> ()
    %cst_24 = arith.constant 0.353553385 : f32
    %46 = vector.broadcast %cst_24 : f32 to vector<4x8x8xf32>
    %47 = arith.mulf %39, %46 : vector<4x8x8xf32>
    %48 = arith.truncf %47 : vector<4x8x8xf32> to vector<4x8x8xbf16>
    %49 = arith.truncf %42 : vector<4x8x8xf32> to vector<4x8x8xbf16>
    %50 = arith.truncf %45 : vector<4x8x8xf32> to vector<4x8x8xbf16>
    "tpu.trace_start"() <{level = 10 : i32, message = "znd,zmd->znm"}> : () -> ()
    %cst_25 = arith.constant dense<0.000000e+00> : vector<4x8x8xf32>
    %51 = tpu.matmul %48, %49, %cst_25 {dimension_numbers = #tpu.dot_dimension_numbers<[2], [2], [1], [1], [0, 0, 0, 1, 1, 1], [0], [0]>} : vector<4x8x8xbf16>, vector<4x8x8xbf16>, vector<4x8x8xf32> -> vector<4x8x8xf32>
    "tpu.trace_stop"() : () -> ()
    %cst_26 = arith.constant dense<0xFF800000> : vector<4x8xf32>
    %52 = vector.multi_reduction <maximumf>, %51, %cst_26 [2] : vector<4x8x8xf32> to vector<4x8xf32>
    %53 = vector.shape_cast %52 : vector<4x8xf32> to vector<4x8x1xf32>
    %54 = vector.broadcast %53 : vector<4x8x1xf32> to vector<4x8x8xf32>
    %55 = arith.subf %51, %54 : vector<4x8x8xf32>
    %56 = math.exp %55 : vector<4x8x8xf32>
    %cst_27 = arith.constant dense<0.000000e+00> : vector<4x8xf32>
    %57 = vector.multi_reduction <add>, %56, %cst_27 [2] : vector<4x8x8xf32> to vector<4x8xf32>
    %58 = vector.shape_cast %57 : vector<4x8xf32> to vector<4x8x1xf32>
    %59 = tpu.reciprocal %58 {approx = true} : vector<4x8x1xf32> -> vector<4x8x1xf32>
    %60 = vector.broadcast %59 : vector<4x8x1xf32> to vector<4x8x8xf32>
    %61 = arith.mulf %56, %60 : vector<4x8x8xf32>
    %62 = arith.truncf %61 : vector<4x8x8xf32> to vector<4x8x8xbf16>
    "tpu.trace_start"() <{level = 10 : i32, message = "znm,zmd->znd"}> : () -> ()
    %cst_28 = arith.constant dense<0.000000e+00> : vector<4x8x8xf32>
    %63 = tpu.matmul %62, %50, %cst_28 {dimension_numbers = #tpu.dot_dimension_numbers<[2], [1], [1], [2], [0, 0, 0, 1, 1, 2], [0], [0]>} : vector<4x8x8xbf16>, vector<4x8x8xbf16>, vector<4x8x8xf32> -> vector<4x8x8xf32>
    "tpu.trace_stop"() : () -> ()
    %64 = arith.truncf %63 : vector<4x8x8xf32> to vector<4x8x8xbf16>
    %c0_29 = arith.constant 0 : index
    %c0_30 = arith.constant 0 : index
    %c0_31 = arith.constant 0 : index
    %c0_32 = arith.constant 0 : index
    %65 = vector.load %arg6[%c0_29, %c0_30, %c0_31, %c0_32] : memref<1x4x8x32xbf16, #tpu.memory_space<vmem>>, vector<1x4x8x32xbf16>
    %66 = vector.shape_cast %65 : vector<1x4x8x32xbf16> to vector<4x8x32xbf16>
    "tpu.trace_start"() <{level = 10 : i32, message = "hre,heo->hro"}> : () -> ()
    %cst_33 = arith.constant dense<0.000000e+00> : vector<4x8x32xf32>
    %67 = tpu.matmul %64, %66, %cst_33 {dimension_numbers = #tpu.dot_dimension_numbers<[2], [1], [1], [2], [0, 0, 0, 1, 1, 2], [0], [0]>} : vector<4x8x8xbf16>, vector<4x8x32xbf16>, vector<4x8x32xf32> -> vector<4x8x32xf32>
    "tpu.trace_stop"() : () -> ()
    %68 = vector.extract_strided_slice %67 {offsets = [0, 0, 0], sizes = [1, 8, 32], strides = [1, 1, 1]} : vector<4x8x32xf32> to vector<1x8x32xf32>
    %69 = vector.shape_cast %68 : vector<1x8x32xf32> to vector<8x32xf32>
    %70 = vector.extract_strided_slice %67 {offsets = [1, 0, 0], sizes = [1, 8, 32], strides = [1, 1, 1]} : vector<4x8x32xf32> to vector<1x8x32xf32>
    %71 = vector.shape_cast %70 : vector<1x8x32xf32> to vector<8x32xf32>
    %72 = arith.addf %69, %71 : vector<8x32xf32>
    %73 = vector.extract_strided_slice %67 {offsets = [2, 0, 0], sizes = [1, 8, 32], strides = [1, 1, 1]} : vector<4x8x32xf32> to vector<1x8x32xf32>
    %74 = vector.shape_cast %73 : vector<1x8x32xf32> to vector<8x32xf32>
    %75 = arith.addf %72, %74 : vector<8x32xf32>
    %76 = vector.extract_strided_slice %67 {offsets = [3, 0, 0], sizes = [1, 8, 32], strides = [1, 1, 1]} : vector<4x8x32xf32> to vector<1x8x32xf32>
    %77 = vector.shape_cast %76 : vector<1x8x32xf32> to vector<8x32xf32>
    %78 = arith.addf %75, %77 : vector<8x32xf32>
    %79 = arith.addf %3, %78 : vector<8x32xf32>
    %80 = vector.extract_strided_slice %5 {offsets = [2, 0], sizes = [1, 32], strides = [1, 1]} : vector<8x32xf32> to vector<1x32xf32>
    %81 = vector.shape_cast %80 : vector<1x32xf32> to vector<32xf32>
    %82 = vector.shape_cast %81 : vector<32xf32> to vector<1x32xf32>
    %83 = vector.broadcast %82 : vector<1x32xf32> to vector<8x32xf32>
    %84 = arith.addf %79, %83 : vector<8x32xf32>
    %85 = vector.extract_strided_slice %5 {offsets = [3, 0], sizes = [1, 32], strides = [1, 1]} : vector<8x32xf32> to vector<1x32xf32>
    %86 = vector.shape_cast %85 : vector<1x32xf32> to vector<32xf32>
    %87 = vector.extract_strided_slice %5 {offsets = [4, 0], sizes = [1, 32], strides = [1, 1]} : vector<8x32xf32> to vector<1x32xf32>
    %88 = vector.shape_cast %87 : vector<1x32xf32> to vector<32xf32>
    %cst_34 = arith.constant dense<0.000000e+00> : vector<8xf32>
    %89 = vector.multi_reduction <add>, %84, %cst_34 [1] : vector<8x32xf32> to vector<8xf32>
    %90 = vector.shape_cast %89 : vector<8xf32> to vector<8x1xf32>
    %cst_35 = arith.constant 3.200000e+01 : f32
    %91 = vector.broadcast %cst_35 : f32 to vector<8x1xf32>
    %92 = arith.divf %90, %91 : vector<8x1xf32>
    %93 = vector.broadcast %92 : vector<8x1xf32> to vector<8x32xf32>
    %94 = arith.subf %84, %93 : vector<8x32xf32>
    %95 = arith.mulf %94, %94 : vector<8x32xf32>
    %cst_36 = arith.constant dense<0.000000e+00> : vector<8xf32>
    %96 = vector.multi_reduction <add>, %95, %cst_36 [1] : vector<8x32xf32> to vector<8xf32>
    %97 = vector.shape_cast %96 : vector<8xf32> to vector<8x1xf32>
    %cst_37 = arith.constant 3.200000e+01 : f32
    %98 = vector.broadcast %cst_37 : f32 to vector<8x1xf32>
    %99 = arith.divf %97, %98 : vector<8x1xf32>
    %100 = vector.broadcast %92 : vector<8x1xf32> to vector<8x32xf32>
    %101 = arith.subf %84, %100 : vector<8x32xf32>
    %cst_38 = arith.constant 9.99999974E-6 : f32
    %102 = vector.broadcast %cst_38 : f32 to vector<8x1xf32>
    %103 = arith.addf %99, %102 : vector<8x1xf32>
    %104 = math.rsqrt %103 : vector<8x1xf32>
    %105 = vector.broadcast %104 : vector<8x1xf32> to vector<8x32xf32>
    %106 = arith.mulf %101, %105 : vector<8x32xf32>
    %107 = vector.shape_cast %86 : vector<32xf32> to vector<1x32xf32>
    %108 = vector.broadcast %107 : vector<1x32xf32> to vector<8x32xf32>
    %109 = arith.mulf %106, %108 : vector<8x32xf32>
    %110 = vector.shape_cast %88 : vector<32xf32> to vector<1x32xf32>
    %111 = vector.broadcast %110 : vector<1x32xf32> to vector<8x32xf32>
    %112 = arith.addf %109, %111 : vector<8x32xf32>
    %113 = arith.truncf %112 : vector<8x32xf32> to vector<8x32xbf16>
    %c0_39 = arith.constant 0 : index
    %c0_40 = arith.constant 0 : index
    %c0_41 = arith.constant 0 : index
    %114 = vector.load %arg7[%c0_39, %c0_40, %c0_41] : memref<1x32x64xbf16, #tpu.memory_space<vmem>>, vector<1x32x64xbf16>
    %115 = vector.shape_cast %114 : vector<1x32x64xbf16> to vector<32x64xbf16>
    %cst_42 = arith.constant dense<0.000000e+00> : vector<8x64xf32>
    %116 = tpu.matmul %113, %115, %cst_42 {dimension_numbers = #tpu.dot_dimension_numbers<[1], [0], [0], [1], [0, 0, 1, 1], [], []>} : vector<8x32xbf16>, vector<32x64xbf16>, vector<8x64xf32> -> vector<8x64xf32>
    %c0_43 = arith.constant 0 : index
    %c0_44 = arith.constant 0 : index
    %c0_45 = arith.constant 0 : index
    %117 = vector.load %arg10[%c0_43, %c0_44, %c0_45] : memref<1x1x64xf32, #tpu.memory_space<vmem>>, vector<1x1x64xf32>
    %118 = vector.shape_cast %117 : vector<1x1x64xf32> to vector<64xf32>
    %119 = vector.shape_cast %118 : vector<64xf32> to vector<1x64xf32>
    %120 = vector.broadcast %119 : vector<1x64xf32> to vector<8x64xf32>
    %121 = arith.addf %116, %120 : vector<8x64xf32>
    %cst_46 = arith.constant 5.000000e-01 : f32
    %122 = vector.broadcast %cst_46 : f32 to vector<8x64xf32>
    %123 = arith.mulf %122, %121 : vector<8x64xf32>
    %cst_47 = arith.constant 0.707106769 : f32
    %124 = vector.broadcast %cst_47 : f32 to vector<8x64xf32>
    %125 = arith.mulf %121, %124 : vector<8x64xf32>
    %126 = math.erf %125 : vector<8x64xf32>
    %cst_48 = arith.constant 1.000000e+00 : f32
    %127 = vector.broadcast %cst_48 : f32 to vector<8x64xf32>
    %128 = arith.addf %127, %126 : vector<8x64xf32>
    %129 = arith.mulf %123, %128 : vector<8x64xf32>
    %130 = arith.truncf %129 : vector<8x64xf32> to vector<8x64xbf16>
    %c0_49 = arith.constant 0 : index
    %c0_50 = arith.constant 0 : index
    %c0_51 = arith.constant 0 : index
    %131 = vector.load %arg8[%c0_49, %c0_50, %c0_51] : memref<1x64x32xbf16, #tpu.memory_space<vmem>>, vector<1x64x32xbf16>
    %132 = vector.shape_cast %131 : vector<1x64x32xbf16> to vector<64x32xbf16>
    %cst_52 = arith.constant dense<0.000000e+00> : vector<8x32xf32>
    %133 = tpu.matmul %130, %132, %cst_52 {dimension_numbers = #tpu.dot_dimension_numbers<[1], [0], [0], [1], [0, 0, 1, 1], [], []>} : vector<8x64xbf16>, vector<64x32xbf16>, vector<8x32xf32> -> vector<8x32xf32>
    %134 = vector.extract_strided_slice %5 {offsets = [5, 0], sizes = [1, 32], strides = [1, 1]} : vector<8x32xf32> to vector<1x32xf32>
    %135 = vector.shape_cast %134 : vector<1x32xf32> to vector<32xf32>
    %136 = vector.shape_cast %135 : vector<32xf32> to vector<1x32xf32>
    %137 = vector.broadcast %136 : vector<1x32xf32> to vector<8x32xf32>
    %138 = arith.addf %133, %137 : vector<8x32xf32>
    %139 = arith.addf %84, %138 : vector<8x32xf32>
    %c0_53 = arith.constant 0 : index
    %c0_54 = arith.constant 0 : index
    %140 = vector.load %arg13[%c0_53, %c0_54] : memref<8x32xf32, #tpu.memory_space<vmem>>, vector<8x32xf32>
    tpu.vector_store %arg13[%c0_53, %c0_54], %139 {strides = array<i32>} : memref<8x32xf32, #tpu.memory_space<vmem>>, vector<8x32xf32>,
    %c1_i32 = arith.constant 1 : i32
    %141 = arith.cmpi eq, %arg1, %c1_i32 : i32
    %142 = arith.extui %141 : i1 to i32
    %c0_i32_55 = arith.constant 0 : i32
    %143 = arith.cmpi ne, %142, %c0_i32_55 : i32
    scf.if %143 {
      %c0_56 = arith.constant 0 : index
      %c0_57 = arith.constant 0 : index
      %144 = vector.load %arg11[%c0_56, %c0_57] : memref<2x32xf32, #tpu.memory_space<vmem>>, vector<1x32xf32>
      %145 = vector.shape_cast %144 : vector<1x32xf32> to vector<32xf32>
      %c1 = arith.constant 1 : index
      %c0_58 = arith.constant 0 : index
      %146 = vector.load %arg11[%c1, %c0_58] : memref<2x32xf32, #tpu.memory_space<vmem>>, vector<1x32xf32>
      %147 = vector.shape_cast %146 : vector<1x32xf32> to vector<32xf32>
      %cst_59 = arith.constant dense<0.000000e+00> : vector<8xf32>
      %148 = vector.multi_reduction <add>, %139, %cst_59 [1] : vector<8x32xf32> to vector<8xf32>
      %149 = vector.shape_cast %148 : vector<8xf32> to vector<8x1xf32>
      %cst_60 = arith.constant 3.200000e+01 : f32
      %150 = vector.broadcast %cst_60 : f32 to vector<8x1xf32>
      %151 = arith.divf %149, %150 : vector<8x1xf32>
      %152 = vector.broadcast %151 : vector<8x1xf32> to vector<8x32xf32>
      %153 = arith.subf %139, %152 : vector<8x32xf32>
      %154 = arith.mulf %153, %153 : vector<8x32xf32>
      %cst_61 = arith.constant dense<0.000000e+00> : vector<8xf32>
      %155 = vector.multi_reduction <add>, %154, %cst_61 [1] : vector<8x32xf32> to vector<8xf32>
      %156 = vector.shape_cast %155 : vector<8xf32> to vector<8x1xf32>
      %cst_62 = arith.constant 3.200000e+01 : f32
      %157 = vector.broadcast %cst_62 : f32 to vector<8x1xf32>
      %158 = arith.divf %156, %157 : vector<8x1xf32>
      %159 = vector.broadcast %151 : vector<8x1xf32> to vector<8x32xf32>
      %160 = arith.subf %139, %159 : vector<8x32xf32>
      %cst_63 = arith.constant 9.99999974E-6 : f32
      %161 = vector.broadcast %cst_63 : f32 to vector<8x1xf32>
      %162 = arith.addf %158, %161 : vector<8x1xf32>
      %163 = math.rsqrt %162 : vector<8x1xf32>
      %164 = vector.broadcast %163 : vector<8x1xf32> to vector<8x32xf32>
      %165 = arith.mulf %160, %164 : vector<8x32xf32>
      %166 = vector.shape_cast %145 : vector<32xf32> to vector<1x32xf32>
      %167 = vector.broadcast %166 : vector<1x32xf32> to vector<8x32xf32>
      %168 = arith.mulf %165, %167 : vector<8x32xf32>
      %169 = vector.shape_cast %147 : vector<32xf32> to vector<1x32xf32>
      %170 = vector.broadcast %169 : vector<1x32xf32> to vector<8x32xf32>
      %171 = arith.addf %168, %170 : vector<8x32xf32>
      %c0_64 = arith.constant 0 : index
      %c0_65 = arith.constant 0 : index
      %172 = vector.load %arg12[%c0_64, %c0_65] : memref<8x32xf32, #tpu.memory_space<vmem>>, vector<8x32xf32>
      tpu.vector_store %arg12[%c0_64, %c0_65], %171 {strides = array<i32>} : memref<8x32xf32, #tpu.memory_space<vmem>>, vector<8x32xf32>,
    } else {
    }
    return
  }
  func.func @transform_0(%arg0: i32, %arg1: i32) -> (i32, i32) {
    %c0_i32 = arith.constant 0 : i32
    %c0_i32_0 = arith.constant 0 : i32
    return %arg0, %c0_i32 : i32, i32
  }
  func.func @transform_1(%arg0: i32, %arg1: i32) -> (i32, i32, i32, i32) {
    %c0_i32 = arith.constant 0 : i32
    %c0_i32_0 = arith.constant 0 : i32
    %c0_i32_1 = arith.constant 0 : i32
    %c0_i32_2 = arith.constant 0 : i32
    return %arg1, %c0_i32, %c0_i32_0, %c0_i32_1 : i32, i32, i32, i32
  }
  func.func @transform_2(%arg0: i32, %arg1: i32) -> (i32, i32, i32, i32) {
    %c0_i32 = arith.constant 0 : i32
    %c0_i32_0 = arith.constant 0 : i32
    %c0_i32_1 = arith.constant 0 : i32
    %c0_i32_2 = arith.constant 0 : i32
    return %arg1, %c0_i32, %c0_i32_0, %c0_i32_1 : i32, i32, i32, i32
  }
  func.func @transform_3(%arg0: i32, %arg1: i32) -> (i32, i32, i32, i32) {
    %c0_i32 = arith.constant 0 : i32
    %c0_i32_0 = arith.constant 0 : i32
    %c0_i32_1 = arith.constant 0 : i32
    %c0_i32_2 = arith.constant 0 : i32
    return %arg1, %c0_i32, %c0_i32_0, %c0_i32_1 : i32, i32, i32, i32
  }
  func.func @transform_4(%arg0: i32, %arg1: i32) -> (i32, i32, i32, i32) {
    %c0_i32 = arith.constant 0 : i32
    %c0_i32_0 = arith.constant 0 : i32
    %c0_i32_1 = arith.constant 0 : i32
    %c0_i32_2 = arith.constant 0 : i32
    return %arg1, %c0_i32, %c0_i32_0, %c0_i32_1 : i32, i32, i32, i32
  }
  func.func @transform_5(%arg0: i32, %arg1: i32) -> (i32, i32, i32) {
    %c0_i32 = arith.constant 0 : i32
    %c0_i32_0 = arith.constant 0 : i32
    %c0_i32_1 = arith.constant 0 : i32
    return %arg1, %c0_i32, %c0_i32_0 : i32, i32, i32
  }
  func.func @transform_6(%arg0: i32, %arg1: i32) -> (i32, i32, i32) {
    %c0_i32 = arith.constant 0 : i32
    %c0_i32_0 = arith.constant 0 : i32
    %c0_i32_1 = arith.constant 0 : i32
    return %arg1, %c0_i32, %c0_i32_0 : i32, i32, i32
  }
  func.func @transform_7(%arg0: i32, %arg1: i32) -> (i32, i32, i32) {
    %c0_i32 = arith.constant 0 : i32
    %c0_i32_0 = arith.constant 0 : i32
    %c0_i32_1 = arith.constant 0 : i32
    return %arg1, %c0_i32, %c0_i32_0 : i32, i32, i32
  }
  func.func @transform_8(%arg0: i32, %arg1: i32) -> (i32, i32, i32) {
    %c0_i32 = arith.constant 0 : i32
    %c0_i32_0 = arith.constant 0 : i32
    %c0_i32_1 = arith.constant 0 : i32
    return %arg1, %c0_i32, %c0_i32_0 : i32, i32, i32
  }
  func.func @transform_9(%arg0: i32, %arg1: i32) -> (i32, i32) {
    %c0_i32 = arith.constant 0 : i32
    %c0_i32_0 = arith.constant 0 : i32
    %c0_i32_1 = arith.constant 0 : i32
    return %c0_i32, %c0_i32_0 : i32, i32
  }
  func.func @transform_10(%arg0: i32, %arg1: i32) -> (i32, i32) {
    %c0_i32 = arith.constant 0 : i32
    %c0_i32_0 = arith.constant 0 : i32
    return %arg0, %c0_i32 : i32, i32
  }
}

</mosaic_0001>

<bundles_post_ra>
// kernel: tpu_custom_call.1
= control target key start
LH: loop header
LB: loop body
LE: loop exit
PB: predicated region body
PF: predicated region fallthrough
CT: control target
= control target key end

     0   :  { %s3299_s0 = inlined_call_operand.vmem [shape: f32[16,32], index: 0, kind: input, shape index: {}]   ;;  %s3300_s1 = inlined_call_operand.vmem [shape: bf16[2,4,32,8], index: 1, kind: input, shape index: {}]   ;;  %s3301_s2 = inlined_call_operand.vmem [shape: bf16[2,4,32,8], index: 2, kind: input, shape index: {}]   ;;  %s3302_s3 = inlined_call_operand.vmem [shape: bf16[2,4,32,8], index: 3, kind: input, shape index: {}]   ;;  %s3303_s4 = inlined_call_operand.vmem [shape: bf16[2,4,8,32], index: 4, kind: input, shape index: {}]   ;;  %s3304_s5 = inlined_call_operand.vmem [shape: bf16[2,32,64], index: 5, kind: input, shape index: {}]   ;;  %s3305_s6 = inlined_call_operand.vmem [shape: bf16[2,64,32], index: 6, kind: input, shape index: {}]   ;;  %s3306_s7 = inlined_call_operand.vmem [shape: f32[2,8,32], index: 7, kind: input, shape index: {}]   ;;  %s3307_s8 = inlined_call_operand.vmem [shape: f32[2,1,64], index: 8, kind: input, shape index: {}]   ;;  %s3308_s9 = inlined_call_operand.vmem [shape: f32[2,32], index: 9, kind: input, shape index: {}]   ;;  %s3309_s10 = inlined_call_operand.hbm [shape: f32[16,32], index: 10, kind: output, shape index: {}]  }
   0x1   :  { %3322 = sst [smem:[#allocation16_spill]] %s3299_s0 }
   0x2   :  { %3323 = sst [smem:[#allocation17_spill]] %s3300_s1 }
   0x3   :  { %3324 = sst [smem:[#allocation18_spill]] %s3301_s2 }
   0x4   :  { %3325 = sst [smem:[#allocation19_spill]] %s3302_s3 }
   0x5   :  { %3326 = sst [smem:[#allocation20_spill]] %s3303_s4 }
   0x6   :  { %3327 = sst [smem:[#allocation21_spill]] %s3309_s10 }
   0x7   :  { %15 = vsyncpa [#allocation4], 0 }
   0x8   :  { %17 = vsyncpa [#allocation4 + $0x1], 0  ;;  %s2877_s13 = smov 0   ;;  %s2879_s14 = smov 0  }
   0x9   :  { %s2881_s15 = smov 0   ;;  %s2883_s16 = smov 0  }
   0xa   :  { %s2885_s17 = smov 0   ;;  %s2887_s18 = smov 0  }
   0xb   :  { %s2889_s19 = smov 0   ;;  %s2891_s20 = smov 0  }
   0xc LB: > { %3328 = sst [smem:[#allocation6_spill]] %s2789_s13  ;;  %s2249_s21 = sadd.s32 4294967295, %s2817_s20   ;;  %s2817_s20 = sphi %s2891_s20, %s23_s20   ;;  %s2813_s19 = sphi %s2889_s19, %s3356_s19   ;;  %s2809_s18 = sphi %s2887_s18, %s3355_s18   ;;  %s2805_s17 = sphi %s2885_s17, %s3354_s17   ;;  %s2801_s16 = sphi %s2883_s16, %s3359_s16   ;;  %s2797_s15 = sphi %s2881_s15, %s3352_s15   ;;  %s2793_s14 = sphi %s2879_s14, %s3358_s14   ;;  %s2789_s13 = sphi %s2877_s13, %s3357_s13  }
   0xd   : > { %3329 = sst [smem:[#allocation7_spill]] %s2797_s15  ;;  %s2250_s22 = sadd.s32 4294967294, %s2817_s20  }
   0xe   : > { %3330 = sst [smem:[#allocation8_spill]] %s2809_s18  ;;  %s32_s23 = sadd.s32 1, %s2809_s18 }
   0xf   : > { %3331 = sst [smem:[#allocation9_spill]] %s2813_s19  ;;  %p33_p0 = scmp.ge.s32.totalorder %s32_s23, 2 }
  0x10   : > { %3332 = sst [smem:[#allocation10_spill]] %s2817_s20  ;;  %s35_s24 = sadd.s32 1, %s2813_s19 }
  0x11   : > { %p307_p1 = scmp.ne.s32.totalorder %s2797_s15, %s2793_s14  ;;  %p308_p2 = scmp.eq.s32.totalorder %s2249_s21, 3 }
  0x12   : > { %s3361_s23 = smov (%p33_p0, %s32_s23), 0  ;;  %s3363_s24 = smov (!%p33_p0, %s35_s24), %s2813_s19 }
  0x13   : > { %3333 = sst [smem:[#allocation11_spill]] %s3361_s23  ;;  %p2926_p3 = por %p308_p2, %p307_p1 }
  0x14   : > { %p313_p4 = scmp.ne.s32.totalorder %s2793_s14, %s2789_s13  ;;  %p37_p5 = scmp.ge.s32.totalorder %s3363_s24, 2 }
  0x15   : > { %s3334_s25 = scalar_select %p2926_p3, 1, 0 }
  0x16   : > { %p314_p6 = scmp.eq.s32.totalorder %s2250_s22, 3  ;;  %p2253_p7 = scmp.ge.s32.totalorder %s2817_s20, 1 }
  0x17   : > { %3335 = sst [smem:[#allocation12_spill]] %s3334_s25  ;;  %p403_p8 = scmp.lt.s32.totalorder %s2817_s20, 5 }
  0x18   : > { %s3365_s24 = smov (%p37_p5, %s3363_s24), 0  ;;  %p2936_p9 = por %p314_p6, %p313_p4 }
  0x19   : > { %3336 = sst [smem:[#allocation13_spill]] %s3365_s24  ;;  %p404_p10 = pnand %p2253_p7, %p403_p8 }
  0x1a   : > { %s3337_s26 = scalar_select %p2936_p9, 1, 0 }
  0x1b   : > { %s294_s27 = ssub.s32 %s2813_s19, %s3365_s24  ;;  %s297_s28 = sadd.s32 1, %s2797_s15 }
  0x1c   : > { %3338 = sst [smem:[#allocation14_spill]] %s3337_s26  ;;  %p295_p11 = scmp.eq.s32.totalorder %s294_s27, 0 }
  0x1d   : > { %407 = sbr.rel (%p404_p10) target bundleno = 2683 (0xa7b), region = 60  ;;  %s3313_s30 = sand.u32 (!%p404_p10), 1, %s2793_s14  }
  0x1e   : > { %s2944_s29 = scalar_select %p295_p11, %s2797_s15, %s297_s28  }
  0x1f   : > { %p477_p12 = scmp.lt.s32.totalorder (!%p404_p10), %s2805_s17, 1  ;;  %s2950_s11 = sshll.u32 (!%p404_p10), %s3313_s30, 3 }
  0x20   : > { %3339 = sst [smem:[#allocation15_spill]] %s2944_s29  ;;  %p481_p13 = scmp.lt.s32.totalorder (!%p404_p10), %s2801_s16, 1 }
  0x21   : > { %s3340_s0 = sld [smem:[#allocation16_spill]] (!%p404_p10)  ;;  %s3341_s1 = sld [smem:[#allocation17_spill]] (!%p404_p10) }
  0x22   : > { %s3342_s2 = sld [smem:[#allocation18_spill]] (!%p404_p10)  ;;  %s3343_s3 = sld [smem:[#allocation19_spill]] (!%p404_p10) }
  0x23   : > { %s3344_s4 = sld [smem:[#allocation20_spill]] (!%p404_p10)  ;;  %p2269_p0 = scmp.ne.s32.totalorder (!%p404_p10), %s2801_s16, 0 }
  0x24   : > { %s478_s12 = scalar_select %p477_p12, %s2805_s17, 1 }
  0x25   : > { %s2955_s21 = scalar_select %p481_p13, %s2801_s16, 1 }
  0x26   : > { %s2255_s22 = sshll.u32 %s478_s12, 3  ;;  %vm524_vm0 = vcmask (!%p2269_p0), 261120  }
  0x27   : > { %s480_s24 = scalar_lea.vmem %s3340_s0, %s2255_s22  ;;  %s2334_s23 = sshll.u32 %s2955_s21, 6 }
  0x28   : > { %s2964_s30 = scalar_lea.vmem %s3341_s1, %s2334_s23  ;;  %s2969_s26 = scalar_lea.vmem %s3342_s2, %s2334_s23  ;;  %v523_v0 = vld [vmem:[%s480_s24] sm:$0xff] (!%p2269_p0) }
  0x29   : > { %s2974_s10 = scalar_lea.vmem %s3343_s3, %s2334_s23  ;;  %s2337_s12 = sshll.u32 %s2955_s21, 4  ;;  %525 = vst.msk [vmem:[#allocation2] sm:$0xff] (!%p2269_p0), %vm524_vm0, %v523_v0 }
  0x2a   : > { %s2980_s22 = scalar_lea.vmem %s3344_s4, %s2337_s12  ;;  %s2985_s19 = scalar_lea.vmem %s3304_s5, %s2337_s12 }
  0x2b   : > { %s2339_s0 = sshll.u32 %s2955_s21, 5  ;;  %s2268_s15 = sshll.u32 %s2955_s21, 3 }
  0x2c   : > { %s2992_s2 = scalar_lea.vmem %s3305_s6, %s2339_s0  ;;  %s2997_s23 = scalar_lea.vmem %s3306_s7, %s2268_s15 }
  0x2d   : > { %s517_s3 = scalar_lea.vmem %s3307_s8, %s2955_s21  ;;  %s476_s4 = scalar_lea.vmem [#allocation3], %s2950_s11 }
  0x2e   : > { %522 = sbr.rel (%p2269_p0) target bundleno = 53 (0x35), region = 64 }
  0x35 PF: > { %v3005_v1 = vld [vmem:[#allocation2] sm:$0xff]  ;;  %vm528_vm1 = vcmask 261120   ;;  %v2670_v9 = vld [vmem:[%s2964_s30 + $0x10] sm:$0xff]   ;;  %v2819_v10 = vmov 0.0   ;;  %v2671_v11 = vld [vmem:[%s2964_s30 + $0x8] sm:$0xff]   ;;  %vm2820_vm2 = vmmov 0   ;;  %v543_v15 = vlaneseq }
  0x36   : > { %v529_v2 = vsel %vm528_vm1, %v3005_v1, 0.0  ;;  %v2669_v8 = vld [vmem:[%s2964_s30] sm:$0xff]   ;;  %2408 = vmatprep.subr.bf16.mxu0 %v2819_v10  ;;  %2416 = vmatprep.subr.bf16.mxu1 %v2819_v10  ;;  %v2672_v12 = vld [vmem:[%s2964_s30 + $0x18] sm:$0xff]   ;;  %v2674_v28 = vld [vmem:[%s2964_s30 + $0x30] sm:$0xff]   ;;  %vm1245_vm3 = vcmask 64512   ;;  %vm1481_vm4 = vcmask 1043456  }
  0x37   : > { %530 = vadd.xlane.f32.xlu0 %v529_v2  ;;  %2409 = vmatpush3.bf16.msra.mxu0 %v2669_v8  ;;  %v3025_v17 = vshrl.u32 %v543_v15, 7  ;;  %v3029_v19 = vld [vmem:[%s2997_s23] sm:$0xff]  ;;  %v2675_v30 = vld [vmem:[%s2964_s30 + $0x28] sm:$0xff]   ;;  %v2676_v31 = vld [vmem:[%s2964_s30 + $0x38] sm:$0xff]   ;;  %vm1996_vm5 = vcmask 523264   ;;  %p2327_p1 = scmp.ne.s32.totalorder %s2801_s16, 1 }
  0x38   : > { %2417 = vmatpush3.bf16.msra.mxu1 %v2670_v9  ;;  %2410 = vmatprep.subr.bf16.mxu0 %v2819_v10  ;;  %v2673_v27 = vld [vmem:[%s2964_s30 + $0x20] sm:$0xff]   ;;  %v2678_v33 = vld [vmem:[%s2969_s26 + $0x10] sm:$0xff]   ;;  %v2679_v34 = vld [vmem:[%s2969_s26 + $0x8] sm:$0xff]  }
  0x39   : > { %2418 = vmatprep.subr.bf16.mxu1 %v2819_v10  ;;  %2412 = vmatprep.mubr.msk.bf16.mxu0 %vm2820_vm2, %v2819_v10  ;;  %v545_v18 = vsub.s32 0, %v3025_v17  ;;  %v550_v20 = vsub.s32 1, %v3025_v17  ;;  %v2677_v32 = vld [vmem:[%s2969_s26] sm:$0xff]   ;;  %v2680_v35 = vld [vmem:[%s2969_s26 + $0x18] sm:$0xff]   ;;  %v2682_v37 = vld [vmem:[%s2969_s26 + $0x30] sm:$0xff]  }
  0x3a   : > { %2420 = vmatprep.mubr.msk.bf16.mxu1 %vm2820_vm2, %v2819_v10  ;;  %v2681_v36 = vld [vmem:[%s2969_s26 + $0x20] sm:$0xff]   ;;  %v2683_v38 = vld [vmem:[%s2969_s26 + $0x28] sm:$0xff]   ;;  %v2684_v39 = vld [vmem:[%s2969_s26 + $0x38] sm:$0xff]  }
  0x3b   : > { %2411 = vmatpush3.bf16.msra.mxu0 %v2671_v11  ;;  %v546_v21 = vrot.slane %v3029_v19, %v545_v18  ;;  %v551_v23 = vrot.slane %v3029_v19, %v550_v20  ;;  %v2685_v40 = vld [vmem:[%s2974_s10] sm:$0xff]   ;;  %v2686_v41 = vld [vmem:[%s2974_s10 + $0x10] sm:$0xff]   ;;  %v2687_v42 = vld [vmem:[%s2974_s10 + $0x8] sm:$0xff]  }
  0x3c   : > { %2419 = vmatpush3.bf16.msra.mxu1 %v2672_v12  ;;  %2424 = vmatprep.subr.bf16.mxu0 %v2819_v10  ;;  %v2688_v43 = vld [vmem:[%s2974_s10 + $0x18] sm:$0xff]   ;;  %v2689_v44 = vld [vmem:[%s2974_s10 + $0x20] sm:$0xff]   ;;  %v2690_v45 = vld [vmem:[%s2974_s10 + $0x30] sm:$0xff]  }
  0x3d   : > { %2432 = vmatprep.subr.bf16.mxu1 %v2819_v10  ;;  %v2691_v46 = vld [vmem:[%s2974_s10 + $0x28] sm:$0xff]   ;;  %v2692_v47 = vld [vmem:[%s2974_s10 + $0x38] sm:$0xff]  }
  0xc4   : > { %v531_v3 = vpop.xlane.xlu0 %530 }
  0xc5   : > { %v533_v4 = vmul.f32 0.03125, %v531_v3 }
  0xc7   : > { %v534_v5 = vsub.f32 %v3005_v1, %v533_v4 }
  0xc9   : > { %v535_v6 = vmul.f32 %v534_v5, %v534_v5 }
  0xcb   : > { %v536_v7 = vsel %vm528_vm1, %v535_v6, 0.0 }
  0xcc   : > { %537 = vadd.xlane.f32.xlu0 %v536_v7 }
 0x159   : > { %v538_v13 = vpop.xlane.xlu0 %537 }
 0x15a   : > { %v539_v14 = vmul.f32 0.03125, %v538_v13 }
 0x15c   : > { %v540_v16 = vadd.f32 1e-05, %v539_v14 }
 0x15e   : > { %2699 = vrsqrt.f32 %v540_v16 }
 0x168   : > { %v2700_v22 = vpop.eup %2699 }
 0x169   : > { %v542_v24 = vmul.f32 %v2700_v22, %v534_v5 }
 0x16b   : > { %v547_v25 = vmul.f32 %v546_v21, %v542_v24 }
 0x16d   : > { %v552_v26 = vadd.f32 %v551_v23, %v547_v25 }
 0x16f   : > { %v3036_v29 = vpack.c.bf16 %v552_v26, %v552_v26 }
 0x171   : > { %2413 = vmatmul.mubr.msk.bf16.vlgmr.msra.gmra.mrb[0].mxu0 %vm528_vm1, %v3036_v29  ;;  %2421 = vmatmul.mubr.msk.bf16.vlgmr.msra.gmra.mrb[0].mxu1 %vm528_vm1, %v3036_v29 }
 0x172   : > { %2425 = vmatpush3.bf16.msra.mxu0 %v2673_v27  ;;  %2433 = vmatpush3.bf16.msra.mxu1 %v2674_v28 }
 0x173   : > { %2426 = vmatprep.subr.bf16.mxu0 %v2819_v10  ;;  %2434 = vmatprep.subr.bf16.mxu1 %v2819_v10 }
 0x174   : > { %2428 = vmatprep.mubr.msk.bf16.mxu0 %vm2820_vm2, %v2819_v10  ;;  %2436 = vmatprep.mubr.msk.bf16.mxu1 %vm2820_vm2, %v2819_v10 }
 0x176   : > { %2427 = vmatpush3.bf16.msra.mxu0 %v2675_v30  ;;  %2435 = vmatpush3.bf16.msra.mxu1 %v2676_v31 }
 0x177   : > { %2440 = vmatprep.subr.bf16.mxu0 %v2819_v10  ;;  %2448 = vmatprep.subr.bf16.mxu1 %v2819_v10 }
 0x179   : > { %2429 = vmatmul.mubr.msk.bf16.vlgmr.msra.gmra.mrb[4].mxu0 %vm528_vm1, %v3036_v29  ;;  %2437 = vmatmul.mubr.msk.bf16.vlgmr.msra.gmra.mrb[4].mxu1 %vm528_vm1, %v3036_v29 }
 0x17a   : > { %2441 = vmatpush3.bf16.msra.mxu0 %v2677_v32  ;;  %2449 = vmatpush3.bf16.msra.mxu1 %v2678_v33 }
 0x17b   : > { %2442 = vmatprep.subr.bf16.mxu0 %v2819_v10  ;;  %2450 = vmatprep.subr.bf16.mxu1 %v2819_v10 }
 0x17c   : > { %2444 = vmatprep.mubr.msk.bf16.mxu0 %vm2820_vm2, %v2819_v10  ;;  %2452 = vmatprep.mubr.msk.bf16.mxu1 %vm2820_vm2, %v2819_v10 }
 0x17e   : > { %2443 = vmatpush3.bf16.msra.mxu0 %v2679_v34  ;;  %2451 = vmatpush3.bf16.msra.mxu1 %v2680_v35 }
 0x17f   : > { %2456 = vmatprep.subr.bf16.mxu0 %v2819_v10  ;;  %2464 = vmatprep.subr.bf16.mxu1 %v2819_v10 }
 0x181   : > { %2445 = vmatmul.mubr.msk.bf16.vlgmr.msra.gmra.mrb[8].mxu0 %vm528_vm1, %v3036_v29  ;;  %2453 = vmatmul.mubr.msk.bf16.vlgmr.msra.gmra.mrb[8].mxu1 %vm528_vm1, %v3036_v29 }
 0x182   : > { %2457 = vmatpush3.bf16.msra.mxu0 %v2681_v36  ;;  %2465 = vmatpush3.bf16.msra.mxu1 %v2682_v37 }
 0x183   : > { %2458 = vmatprep.subr.bf16.mxu0 %v2819_v10  ;;  %2466 = vmatprep.subr.bf16.mxu1 %v2819_v10 }
 0x184   : > { %2460 = vmatprep.mubr.msk.bf16.mxu0 %vm2820_vm2, %v2819_v10  ;;  %2468 = vmatprep.mubr.msk.bf16.mxu1 %vm2820_vm2, %v2819_v10 }
 0x186   : > { %2459 = vmatpush3.bf16.msra.mxu0 %v2683_v38  ;;  %2467 = vmatpush3.bf16.msra.mxu1 %v2684_v39 }
 0x187   : > { %2472 = vmatprep.subr.bf16.mxu0 %v2819_v10  ;;  %2480 = vmatprep.subr.bf16.mxu1 %v2819_v10 }
 0x189   : > { %2461 = vmatmul.mubr.msk.bf16.vlgmr.msra.gmra.mrb[12].mxu0 %vm528_vm1, %v3036_v29  ;;  %2469 = vmatmul.mubr.msk.bf16.vlgmr.msra.gmra.mrb[12].mxu1 %vm528_vm1, %v3036_v29 }
 0x18a   : > { %2473 = vmatpush3.bf16.msra.mxu0 %v2685_v40  ;;  %2481 = vmatpush3.bf16.msra.mxu1 %v2686_v41 }
 0x18b   : > { %2474 = vmatprep.subr.bf16.mxu0 %v2819_v10  ;;  %2482 = vmatprep.subr.bf16.mxu1 %v2819_v10 }
 0x18c   : > { %2476 = vmatprep.mubr.msk.bf16.mxu0 %vm2820_vm2, %v2819_v10  ;;  %2484 = vmatprep.mubr.msk.bf16.mxu1 %vm2820_vm2, %v2819_v10 }
 0x18e   : > { %2475 = vmatpush3.bf16.msra.mxu0 %v2687_v42  ;;  %2483 = vmatpush3.bf16.msra.mxu1 %v2688_v43 }
 0x18f   : > { %2488 = vmatprep.subr.bf16.mxu0 %v2819_v10  ;;  %2496 = vmatprep.subr.bf16.mxu1 %v2819_v10 }
 0x191   : > { %2477 = vmatmul.mubr.msk.bf16.vlgmr.msra.gmra.mrb[16].mxu0 %vm528_vm1, %v3036_v29  ;;  %2485 = vmatmul.mubr.msk.bf16.vlgmr.msra.gmra.mrb[16].mxu1 %vm528_vm1, %v3036_v29 }
 0x192   : > { %2489 = vmatpush3.bf16.msra.mxu0 %v2689_v44  ;;  %2497 = vmatpush3.bf16.msra.mxu1 %v2690_v45 }
 0x193   : > { %2490 = vmatprep.subr.bf16.mxu0 %v2819_v10  ;;  %2498 = vmatprep.subr.bf16.mxu1 %v2819_v10 }
 0x194   : > { %2492 = vmatprep.mubr.msk.bf16.mxu0 %vm2820_vm2, %v2819_v10  ;;  %2500 = vmatprep.mubr.msk.bf16.mxu1 %vm2820_vm2, %v2819_v10 }
 0x196   : > { %2491 = vmatpush3.bf16.msra.mxu0 %v2691_v46  ;;  %2499 = vmatpush3.bf16.msra.mxu1 %v2692_v47 }
 0x197   : > { %2504 = vmatprep.subr.bf16.mxu0 %v2819_v10  ;;  %2510 = vmatprep.subr.bf16.mxu1 %v2819_v10 }
 0x199   : > { %2493 = vmatmul.mubr.msk.bf16.vlgmr.msra.gmra.mrb[20].mxu0 %vm528_vm1, %v3036_v29  ;;  %2501 = vmatmul.mubr.msk.bf16.vlgmr.msra.gmra.mrb[20].mxu1 %vm528_vm1, %v3036_v29 }
 0x19a   : > { %2506 = vmatprep.mubr.msk.bf16.mxu0 %vm2820_vm2, %v2819_v10  ;;  %2512 = vmatprep.mubr.msk.bf16.mxu1 %vm2820_vm2, %v2819_v10 }
 0x244   : > { %v619_v48 = vpop.f32.mrb[0].mxu0  ;;  %v671_v49 = vpop.f32.mrb[0].mxu1 }
 0x245   : > { %v2414_v50 = vpop.f32.mrb[1].mxu0  ;;  %v2422_v51 = vpop.f32.mrb[1].mxu1  ;;  %v1229_v14 = vmul.f32 0.35355338, %v619_v48  ;;  %v1230_v15 = vmul.f32 0.35355338, %v671_v49 }
 0x246   : > { %v622_v52 = vpop.f32.mrb[2].mxu0  ;;  %v674_v53 = vpop.f32.mrb[2].mxu1 }
 0x247   : > { %v2415_v54 = vpop.f32.mrb[3].mxu0  ;;  %v2423_v55 = vpop.f32.mrb[3].mxu1  ;;  %v1233_v20 = vpack.c.bf16 %v1229_v14, %v1229_v14  ;;  %v1234_v21 = vpack.c.bf16 %v1230_v15, %v1230_v15 }
 0x24c   : > { %v723_v56 = vpop.f32.mrb[4].mxu0  ;;  %v775_v57 = vpop.f32.mrb[4].mxu1 }
 0x24d   : > { %v2430_v58 = vpop.f32.mrb[5].mxu0  ;;  %v2438_v59 = vpop.f32.mrb[5].mxu1  ;;  %v1231_v32 = vmul.f32 0.35355338, %v723_v56  ;;  %v1232_v33 = vmul.f32 0.35355338, %v775_v57 }
 0x24e   : > { %v726_v60 = vpop.f32.mrb[6].mxu0  ;;  %v778_v61 = vpop.f32.mrb[6].mxu1 }
 0x24f   : > { %v2431_v62 = vpop.f32.mrb[7].mxu0  ;;  %v2439_v63 = vpop.f32.mrb[7].mxu1  ;;  %v1235_v36 = vpack.c.bf16 %v1231_v32, %v1231_v32  ;;  %v1236_v37 = vpack.c.bf16 %v1232_v33, %v1232_v33 }
 0x254   : > { %v843_v0 = vpop.f32.mrb[8].mxu0  ;;  %v895_v2 = vpop.f32.mrb[8].mxu1 }
 0x255   : > { %v1237_v3 = vpack.c.bf16 %v843_v0, %v843_v0  ;;  %v1238_v4 = vpack.c.bf16 %v895_v2, %v895_v2  ;;  %v2446_v5 = vpop.f32.mrb[9].mxu0  ;;  %v2454_v6 = vpop.f32.mrb[9].mxu1 }
 0x256   : > { %v846_v7 = vpop.f32.mrb[10].mxu0  ;;  %v898_v8 = vpop.f32.mrb[10].mxu1 }
 0x257   : > { %v1250_v9 = vsel %vm1245_vm3, %v1237_v3, 0  ;;  %v1296_v11 = vsel %vm1245_vm3, %v1238_v4, 0  ;;  %v2447_v12 = vpop.f32.mrb[11].mxu0  ;;  %v2455_v13 = vpop.f32.mrb[11].mxu1 }
 0x258   : > { %2505 = vmatpush3.bf16.xpose.msra.mxu0 %v1250_v9  ;;  %2511 = vmatpush3.bf16.xpose.msra.mxu1 %v1296_v11 }
 0x259   : > { %2516 = vmatprep.subr.bf16.mxu0 %v2819_v10  ;;  %2522 = vmatprep.subr.bf16.mxu1 %v2819_v10 }
 0x25c   : > { %v947_v16 = vpop.f32.mrb[12].mxu0  ;;  %v999_v18 = vpop.f32.mrb[12].mxu1 }
 0x25d   : > { %v1239_v22 = vpack.c.bf16 %v947_v16, %v947_v16  ;;  %v1240_v23 = vpack.c.bf16 %v999_v18, %v999_v18  ;;  %v2462_v24 = vpop.f32.mrb[13].mxu0  ;;  %v2470_v25 = vpop.f32.mrb[13].mxu1 }
 0x25e   : > { %v950_v26 = vpop.f32.mrb[14].mxu0  ;;  %v1002_v27 = vpop.f32.mrb[14].mxu1 }
 0x25f   : > { %v1342_v28 = vsel %vm1245_vm3, %v1239_v22, 0  ;;  %v1388_v29 = vsel %vm1245_vm3, %v1240_v23, 0  ;;  %v2463_v30 = vpop.f32.mrb[15].mxu0  ;;  %v2471_v31 = vpop.f32.mrb[15].mxu1  ;;  %2507 = vmatmul.mubr.msk.bf16.vlgmr.msra.gmra.mrb[24].mxu0 %vm1245_vm3, %v1233_v20  ;;  %2513 = vmatmul.mubr.msk.bf16.vlgmr.msra.gmra.mrb[24].mxu1 %vm1245_vm3, %v1234_v21 }
 0x260   : > { %2517 = vmatpush3.bf16.xpose.msra.mxu0 %v1342_v28  ;;  %2523 = vmatpush3.bf16.xpose.msra.mxu1 %v1388_v29 }
 0x261   : > { %2518 = vmatprep.mubr.msk.bf16.mxu0 %vm2820_vm2, %v2819_v10  ;;  %2524 = vmatprep.mubr.msk.bf16.mxu1 %vm2820_vm2, %v2819_v10 }
 0x262   : > { %2528 = vmatprep.subr.bf16.mxu0 %v2819_v10  ;;  %2534 = vmatprep.subr.bf16.mxu1 %v2819_v10 }
 0x264   : > { %v1067_v34 = vpop.f32.mrb[16].mxu0  ;;  %v1119_v35 = vpop.f32.mrb[16].mxu1 }
 0x265   : > { %v1241_v38 = vpack.c.bf16 %v1067_v34, %v1067_v34  ;;  %v1242_v39 = vpack.c.bf16 %v1119_v35, %v1119_v35  ;;  %v2478_v40 = vpop.f32.mrb[17].mxu0  ;;  %v2486_v41 = vpop.f32.mrb[17].mxu1 }
 0x266   : > { %v1070_v42 = vpop.f32.mrb[18].mxu0  ;;  %v1122_v43 = vpop.f32.mrb[18].mxu1 }
 0x267   : > { %v1483_v44 = vsel %vm1481_vm4, %v1241_v38, 0  ;;  %v1529_v45 = vsel %vm1481_vm4, %v1242_v39, 0  ;;  %v2479_v46 = vpop.f32.mrb[19].mxu0  ;;  %v2487_v47 = vpop.f32.mrb[19].mxu1  ;;  %2519 = vmatmul.mubr.msk.bf16.vlgmr.msra.gmra.mrb[28].mxu0 %vm1245_vm3, %v1235_v36  ;;  %2525 = vmatmul.mubr.msk.bf16.vlgmr.msra.gmra.mrb[28].mxu1 %vm1245_vm3, %v1236_v37 }
 0x268   : > { %2529 = vmatpush3.bf16.msra.mxu0 %v1483_v44  ;;  %2535 = vmatpush3.bf16.msra.mxu1 %v1529_v45 }
 0x269   : > { %2530 = vmatprep.mubr.msk.bf16.mxu0 %vm2820_vm2, %v2819_v10  ;;  %2540 = vmatprep.subr.bf16.mxu0 %v2819_v10 }
 0x26a   : > { %2536 = vmatprep.mubr.msk.bf16.mxu1 %vm2820_vm2, %v2819_v10  ;;  %2546 = vmatprep.subr.bf16.mxu1 %v2819_v10 }
 0x26c   : > { %v3148_v48 = vpop.f32.mrb[20].mxu0  ;;  %v3150_v49 = vpop.f32.mrb[20].mxu1 }
 0x26d   : > { %v2494_v50 = vpop.f32.mrb[21].mxu0  ;;  %v2502_v51 = vpop.f32.mrb[21].mxu1  ;;  %v1243_v41 = vpack.c.bf16 %v3148_v48, %v3148_v48  ;;  %v1244_v46 = vpack.c.bf16 %v3150_v49, %v3150_v49 }
 0x26e   : > { %v1174_v52 = vpop.f32.mrb[22].mxu0  ;;  %v1226_v53 = vpop.f32.mrb[22].mxu1 }
 0x26f   : > { %v2495_v54 = vpop.f32.mrb[23].mxu0  ;;  %v2503_v55 = vpop.f32.mrb[23].mxu1  ;;  %v1575_v45 = vsel %vm1481_vm4, %v1243_v41, 0  ;;  %v1621_v52 = vsel %vm1481_vm4, %v1244_v46, 0  ;;  %v1667_v53 = vld [vmem:[%s2980_s22] sm:$0xf] }
 0x332   : > { %v1286_v56 = vpop.f32.mrb[24].mxu0  ;;  %v1332_v57 = vpop.f32.mrb[24].mxu1 }
 0x333   : > { %v2508_v58 = vpop.f32.mrb[25].mxu0  ;;  %v2514_v59 = vpop.f32.mrb[25].mxu1  ;;  %v1430_v60 = vsel %vm1245_vm3, %v1286_v56, -inf  ;;  %v1433_v2 = vsel %vm1245_vm3, %v1332_v57, -inf }
 0x334   : > { %v1335_v61 = vpop.f32.mrb[26].mxu1  ;;  %1431 = vmax.xlane.f32.xlu1 %v1430_v60  ;;  %v1289_v62 = vpop.f32.mrb[26].mxu0  ;;  %v1668_v58 = vld [vmem:[%s2980_s22 + $0x4] sm:$0xf]  ;;  %v1669_v60 = vld [vmem:[%s2980_s22 + $0x8] sm:$0xf] }
 0x335   : > { %v2509_v63 = vpop.f32.mrb[27].mxu0  ;;  %v2515_v0 = vpop.f32.mrb[27].mxu1  ;;  %v1721_v59 = vsel %vm1481_vm4, %v1668_v58, 0  ;;  %v1884_v58 = vsub.s32 4, %v3025_v17 }
 0x336   : > { %v1767_v0 = vsel %vm1481_vm4, %v1669_v60, 0 }
 0x338   : > { %1434 = vmax.xlane.f32.xlu1 %v1433_v2 }
 0x33a   : > { %v1378_v3 = vpop.f32.mrb[28].mxu0  ;;  %v1424_v4 = vpop.f32.mrb[28].mxu1 }
 0x33b   : > { %v2520_v5 = vpop.f32.mrb[29].mxu0  ;;  %v2526_v6 = vpop.f32.mrb[29].mxu1  ;;  %v1439_v7 = vsel %vm1245_vm3, %v1424_v4, -inf  ;;  %v1436_v8 = vsel %vm1245_vm3, %v1378_v3, -inf }
 0x33c   : > { %v1427_v9 = vpop.f32.mrb[30].mxu1  ;;  %1440 = vmax.xlane.f32.xlu1 %v1439_v7  ;;  %1437 = vmax.xlane.f32.xlu0 %v1436_v8  ;;  %v1381_v11 = vpop.f32.mrb[30].mxu0 }
 0x33d   : > { %v2521_v12 = vpop.f32.mrb[31].mxu0  ;;  %v2527_v13 = vpop.f32.mrb[31].mxu1 }
 0x3c1   : > { %v1432_v14 = vpop.xlane.xlu1 %1431 }
 0x3c2   : > { %v1442_v15 = vsub.f32 %v1286_v56, %v1432_v14  ;;  %v1675_v56 = vsel %vm1481_vm4, %v1667_v53, 0 }
 0x3c4   : > { %v1446_v16 = vmul.f32 1.442695, %v1442_v15 }
 0x3c5   : > { %v1435_v18 = vpop.xlane.xlu1 %1434 }
 0x3c6   : > { %2701 = vpow2.f32 %v1446_v16  ;;  %v1443_v20 = vsub.f32 %v1332_v57, %v1435_v18 }
 0x3c8   : > { %v1448_v21 = vmul.f32 1.442695, %v1443_v20 }
 0x3c9   : > { %v1441_v22 = vpop.xlane.xlu1 %1440  ;;  %v1438_v23 = vpop.xlane.xlu0 %1437 }
 0x3ca   : > { %2703 = vpow2.f32 %v1448_v21  ;;  %v1445_v24 = vsub.f32 %v1424_v4, %v1441_v22  ;;  %v1444_v25 = vsub.f32 %v1378_v3, %v1438_v23  ;;  %v1670_v3 = vld [vmem:[%s2980_s22 + $0xc] sm:$0xf] }
 0x3cb   : > { %v1813_v8 = vsel %vm1481_vm4, %v1670_v3, 0  ;;  %v2695_v3 = vld [vmem:[%s2992_s2] sm:$0xff]  }
 0x3cc   : > { %v1452_v26 = vmul.f32 1.442695, %v1445_v24  ;;  %v1450_v27 = vmul.f32 1.442695, %v1444_v25 }
 0x3ce   : > { %2705 = vpow2.f32 %v1452_v26 }
 0x3cf   : > { %2707 = vpow2.f32 %v1450_v27 }
 0x3d0   : > { %v2702_v28 = vpop.eup %2701 }
 0x3d1   : > { %v1454_v29 = vsel %vm1245_vm3, %v2702_v28, 0.0 }
 0x3d2   : > { %1455 = vadd.xlane.f32.xlu0 %v1454_v29 }
 0x3d4   : > { %v2704_v30 = vpop.eup %2703 }
 0x3d5   : > { %v1457_v31 = vsel %vm1245_vm3, %v2704_v30, 0.0 }
 0x3d6   : > { %1458 = vadd.xlane.f32.xlu1 %v1457_v31 }
 0x3d8   : > { %v2706_v32 = vpop.eup %2705 }
 0x3d9   : > { %v2708_v33 = vpop.eup %2707  ;;  %v1463_v34 = vsel %vm1245_vm3, %v2706_v32, 0.0 }
 0x3da   : > { %1464 = vadd.xlane.f32.xlu1 %v1463_v34  ;;  %v1460_v35 = vsel %vm1245_vm3, %v2708_v33, 0.0  ;;  %v1861_v34 = vsub.s32 2, %v3025_v17 }
 0x3db   : > { %1461 = vadd.xlane.f32.xlu0 %v1460_v35 }
 0x3dc   : > { %v1862_v41 = vrot.slane %v3029_v19, %v1861_v34 }
 0x45f   : > { %v1456_v36 = vpop.xlane.xlu0 %1455 }
 0x460   : > { %2709 = vrcp.f32 %v1456_v36 }
 0x463   : > { %v1459_v37 = vpop.xlane.xlu1 %1458 }
 0x464   : > { %2711 = vrcp.f32 %v1459_v37 }
 0x467   : > { %v1465_v38 = vpop.xlane.xlu1 %1464 }
 0x468   : > { %2713 = vrcp.f32 %v1465_v38  ;;  %v1462_v39 = vpop.xlane.xlu0 %1461 }
 0x469   : > { %2715 = vrcp.f32 %v1462_v39 }
 0x46a   : > { %v2710_v40 = vpop.eup %2709 }
 0x46b   : > { %v1470_v42 = vmul.f32 %v2710_v40, %v2702_v28 }
 0x46d   : > { %v1474_v43 = vpack.c.bf16 %v1470_v42, %v1470_v42 }
 0x46e   : > { %v2712_v44 = vpop.eup %2711 }
 0x46f   : > { %v1471_v47 = vmul.f32 %v2712_v44, %v2704_v30  ;;  %2531 = vmatmul.mubr.msk.bf16.vlgmr.msra.gmra.mrb[32].mxu0 %vm1245_vm3, %v1474_v43 }
 0x470   : > { %2541 = vmatpush3.bf16.msra.mxu0 %v1575_v45  ;;  %2542 = vmatprep.mubr.msk.bf16.mxu0 %vm2820_vm2, %v2819_v10 }
 0x471   : > { %v1475_v50 = vpack.c.bf16 %v1471_v47, %v1471_v47  ;;  %2552 = vmatprep.subr.bf16.mxu0 %v2819_v10 }
 0x472   : > { %v2714_v48 = vpop.eup %2713 }
 0x473   : > { %v2716_v51 = vpop.eup %2715  ;;  %2537 = vmatmul.mubr.msk.bf16.vlgmr.msra.gmra.mrb[32].mxu1 %vm1245_vm3, %v1475_v50  ;;  %v1473_v49 = vmul.f32 %v2714_v48, %v2706_v32 }
 0x474   : > { %v1472_v54 = vmul.f32 %v2716_v51, %v2708_v33  ;;  %2547 = vmatpush3.bf16.msra.mxu1 %v1621_v52  ;;  %2548 = vmatprep.mubr.msk.bf16.mxu1 %vm2820_vm2, %v2819_v10 }
 0x475   : > { %2558 = vmatprep.subr.bf16.mxu1 %v2819_v10  ;;  %v1477_v57 = vpack.c.bf16 %v1473_v49, %v1473_v49  ;;  %v2694_v49 = vld [vmem:[%s2985_s19 + $0x8] sm:$0xff]  }
 0x476   : > { %v1476_v55 = vpack.c.bf16 %v1472_v54, %v1472_v54  ;;  %v2693_v54 = vld [vmem:[%s2985_s19] sm:$0xff]  }
 0x478   : > { %2543 = vmatmul.mubr.msk.bf16.vlgmr.msra.gmra.mrb[36].mxu0 %vm1245_vm3, %v1476_v55 }
 0x479   : > { %2553 = vmatpush3.bf16.msra.mxu0 %v1675_v56  ;;  %2554 = vmatprep.mubr.msk.bf16.mxu0 %vm2820_vm2, %v2819_v10 }
 0x47a   : > { %2564 = vmatprep.subr.bf16.mxu0 %v2819_v10 }
 0x47b   : > { %2549 = vmatmul.mubr.msk.bf16.vlgmr.msra.gmra.mrb[36].mxu1 %vm1245_vm3, %v1477_v57  ;;  %v1879_v57 = vsub.s32 3, %v3025_v17 }
 0x47c   : > { %2560 = vmatprep.mubr.msk.bf16.mxu1 %vm2820_vm2, %v2819_v10  ;;  %2559 = vmatpush3.bf16.msra.mxu1 %v1721_v59 }
 0x47d   : > { %2570 = vmatprep.subr.bf16.mxu1 %v2819_v10  ;;  %v1880_v59 = vrot.slane %v3029_v19, %v1879_v57 }
 0x542   : > { %v1519_v61 = vpop.f32.mrb[32].mxu0 }
 0x543   : > { %v1663_v62 = vpack.c.bf16 %v1519_v61, %v1519_v61  ;;  %v2532_v63 = vpop.f32.mrb[33].mxu0 }
 0x544   : > { %v1522_v2 = vpop.f32.mrb[34].mxu0 }
 0x545   : > { %v2533_v4 = vpop.f32.mrb[35].mxu0  ;;  %2555 = vmatmul.mubr.msk.bf16.vlgmr.msra.gmra.mrb[40].mxu0 %vm1245_vm3, %v1663_v62  ;;  %v1885_v62 = vrot.slane %v3029_v19, %v1884_v58 }
 0x546   : > { %v1565_v5 = vpop.f32.mrb[32].mxu1  ;;  %2565 = vmatpush3.bf16.msra.mxu0 %v1767_v0  ;;  %2566 = vmatprep.mubr.msk.bf16.mxu0 %vm2820_vm2, %v2819_v10  ;;  %v2696_v4 = vld [vmem:[%s2992_s2 + $0x8] sm:$0xff]  }
 0x547   : > { %v1664_v6 = vpack.c.bf16 %v1565_v5, %v1565_v5  ;;  %v2538_v7 = vpop.f32.mrb[33].mxu1  ;;  %2576 = vmatprep.subr.bf16.mxu0 %v2819_v10  ;;  %v2697_v5 = vld [vmem:[%s2992_s2 + $0x10] sm:$0xff]  }
 0x548   : > { %v1568_v9 = vpop.f32.mrb[34].mxu1  ;;  %v2318_v7 = vld [vmem:[%s517_s3] ss:$0 sm:$0xff] }
 0x549   : > { %v2539_v11 = vpop.f32.mrb[35].mxu1  ;;  %2561 = vmatmul.mubr.msk.bf16.vlgmr.msra.gmra.mrb[40].mxu1 %vm1245_vm3, %v1664_v6  ;;  %v2698_v6 = vld [vmem:[%s2992_s2 + $0x18] sm:$0xff]  }
 0x54a   : > { %2571 = vmatpush3.bf16.msra.mxu1 %v1813_v8  ;;  %2572 = vmatprep.mubr.msk.bf16.mxu1 %vm2820_vm2, %v2819_v10 }
 0x54b   : > { %v1611_v12 = vpop.f32.mrb[36].mxu0  ;;  %2584 = vmatprep.subr.bf16.mxu1 %v2819_v10 }
 0x54c   : > { %v1665_v13 = vpack.c.bf16 %v1611_v12, %v1611_v12  ;;  %v2544_v14 = vpop.f32.mrb[37].mxu0 }
 0x54d   : > { %v1614_v15 = vpop.f32.mrb[38].mxu0 }
 0x54e   : > { %v2545_v16 = vpop.f32.mrb[39].mxu0  ;;  %2567 = vmatmul.mubr.msk.bf16.vlgmr.msra.gmra.mrb[44].mxu0 %vm1245_vm3, %v1665_v13  ;;  %v1657_v18 = vpop.f32.mrb[36].mxu1 }
 0x54f   : > { %v1666_v20 = vpack.c.bf16 %v1657_v18, %v1657_v18  ;;  %v2550_v21 = vpop.f32.mrb[37].mxu1  ;;  %2580 = vmatprep.mubr.msk.bf16.mxu0 %vm2820_vm2, %v2819_v10  ;;  %2577 = vmatpush3.bf16.msra.mxu0 %v2693_v54 }
 0x550   : > { %v1660_v22 = vpop.f32.mrb[38].mxu1  ;;  %2578 = vmatprep.subr.bf16.mxu0 %v2819_v10  ;;  %v1970_v21 = vsub.s32 5, %v3025_v17 }
 0x551   : > { %v2551_v23 = vpop.f32.mrb[39].mxu1  ;;  %2573 = vmatmul.mubr.msk.bf16.vlgmr.msra.gmra.mrb[44].mxu1 %vm1245_vm3, %v1666_v20 }
 0x552   : > { %2592 = vmatprep.mubr.msk.bf16.mxu1 %vm2820_vm2, %v2819_v10  ;;  %2585 = vmatpush3.bf16.msra.mxu1 %v2695_v3  ;;  %v1971_v22 = vrot.slane %v3029_v19, %v1970_v21 }
 0x553   : > { %2579 = vmatpush3.bf16.msra.mxu0 %v2694_v49  ;;  %2586 = vmatprep.subr.bf16.mxu1 %v2819_v10 }
 0x556   : > { %2587 = vmatpush3.bf16.msra.mxu1 %v2696_v4 }
 0x557   : > { %2588 = vmatprep.subr.bf16.mxu1 %v2819_v10 }
 0x55a   : > { %2589 = vmatpush3.bf16.msra.mxu1 %v2697_v5 }
 0x55b   : > { %2590 = vmatprep.subr.bf16.mxu1 %v2819_v10 }
 0x55e   : > { %2591 = vmatpush3.bf16.msra.mxu1 %v2698_v6 }
 0x618   : > { %v1711_v24 = vpop.f32.mrb[40].mxu0 }
 0x619   : > { %v2556_v25 = vpop.f32.mrb[41].mxu0 }
 0x61a   : > { %v1714_v26 = vpop.f32.mrb[42].mxu0 }
 0x61b   : > { %v2557_v27 = vpop.f32.mrb[43].mxu0 }
 0x61c   : > { %v1757_v28 = vpop.f32.mrb[40].mxu1 }
 0x61d   : > { %v1855_v29 = vadd.f32 %v1757_v28, %v1711_v24  ;;  %v2562_v30 = vpop.f32.mrb[41].mxu1 }
 0x61e   : > { %v1760_v31 = vpop.f32.mrb[42].mxu1 }
 0x61f   : > { %v2563_v32 = vpop.f32.mrb[43].mxu1 }
 0x621   : > { %v1803_v33 = vpop.f32.mrb[44].mxu0 }
 0x622   : > { %v1856_v35 = vadd.f32 %v1855_v29, %v1803_v33  ;;  %v2568_v36 = vpop.f32.mrb[45].mxu0 }
 0x623   : > { %v1806_v37 = vpop.f32.mrb[46].mxu0 }
 0x624   : > { %v2569_v38 = vpop.f32.mrb[47].mxu0  ;;  %v1849_v39 = vpop.f32.mrb[44].mxu1  ;;  %v2328_v37 = vld [vmem:[%s3308_s9] ss:$0 sm:$0xff] (!%p2327_p1) }
 0x625   : > { %v1857_v40 = vadd.f32 %v1856_v35, %v1849_v39  ;;  %v2574_v42 = vpop.f32.mrb[45].mxu1  ;;  %v2329_v39 = vld [vmem:[%s3308_s9 + $0x1] ss:$0 sm:$0xff] (!%p2327_p1) }
 0x626   : > { %v1852_v43 = vpop.f32.mrb[46].mxu1 }
 0x627   : > { %v1858_v44 = vadd.f32 %v1857_v40, %v3005_v1  ;;  %v2575_v45 = vpop.f32.mrb[47].mxu1 }
 0x629   : > { %v1863_v46 = vadd.f32 %v1862_v41, %v1858_v44 }
 0x62b   : > { %v1864_v47 = vsel %vm528_vm1, %v1863_v46, 0.0 }
 0x62c   : > { %1865 = vadd.xlane.f32.xlu0 %v1864_v47 }
 0x6b9   : > { %v1866_v50 = vpop.xlane.xlu0 %1865 }
 0x6ba   : > { %v1867_v48 = vmul.f32 0.03125, %v1866_v50 }
 0x6bc   : > { %v1868_v51 = vsub.f32 %v1863_v46, %v1867_v48 }
 0x6be   : > { %v1869_v52 = vmul.f32 %v1868_v51, %v1868_v51 }
 0x6c0   : > { %v1870_v53 = vsel %vm528_vm1, %v1869_v52, 0.0 }
 0x6c1   : > { %1871 = vadd.xlane.f32.xlu1 %v1870_v53 }
 0x74e   : > { %v1872_v1 = vpop.xlane.xlu1 %1871 }
 0x74f   : > { %v1873_v55 = vmul.f32 0.03125, %v1872_v1 }
 0x751   : > { %v1874_v56 = vadd.f32 1e-05, %v1873_v55 }
 0x753   : > { %2717 = vrsqrt.f32 %v1874_v56 }
 0x75d   : > { %v2718_v60 = vpop.eup %2717 }
 0x75e   : > { %v1876_v61 = vmul.f32 %v2718_v60, %v1868_v51 }
 0x760   : > { %v1881_v63 = vmul.f32 %v1880_v59, %v1876_v61 }
 0x762   : > { %v1886_v0 = vadd.f32 %v1885_v62, %v1881_v63 }
 0x764   : > { %v1887_v2 = vpack.c.bf16 %v1886_v0, %v1886_v0 }
 0x766   : > { %2581 = vmatmul.mubr.msk.bf16.vlgmr.msra.gmra.mrb[48].mxu0 %vm528_vm1, %v1887_v2 }
 0x839   : > { %v1948_v8 = vpop.f32.mrb[48].mxu0 }
 0x83a   : > { %v1949_v9 = vadd.f32 %v2318_v7, %v1948_v8  ;;  %v2582_v11 = vpop.f32.mrb[49].mxu0 }
 0x83b   : > { %v1951_v12 = vpop.f32.mrb[50].mxu0 }
 0x83c   : > { %v1955_v13 = vmul.f32 0.70710677, %v1949_v9  ;;  %v2583_v14 = vpop.f32.mrb[51].mxu0  ;;  %v1954_v16 = vmul.f32 0.5, %v1949_v9 }
 0x83e   : > { %2719 = verf.f32 %v1955_v13 }
 0x848   : > { %v2720_v15 = vpop.eup %2719 }
 0x849   : > { %v1957_v18 = vadd.f32 1.0, %v2720_v15 }
 0x84b   : > { %v1958_v20 = vmul.f32 %v1957_v18, %v1954_v16 }
 0x84d   : > { %v1959_v10 = vpack.c.bf16 %v1958_v20, %v1958_v20 }
 0x84f   : > { %2593 = vmatmul.mubr.msk.bf16.vlgmr.msra.gmra.mrb[48].mxu1 %vm1996_vm5, %v1959_v10 }
 0x921   : > { %2045 = sbr.rel (%p2327_p1) target bundleno = 2657 (0xa61), region = 68 }
 0x922   : > { %v2034_v23 = vpop.f32.mrb[48].mxu1 }
 0x923   : > { %v2035_v24 = vadd.f32 %v2034_v23, %v1971_v22  ;;  %v2594_v25 = vpop.f32.mrb[49].mxu1 }
 0x924   : > { %v2037_v26 = vpop.f32.mrb[50].mxu1 }
 0x925   : > { %v2040_v27 = vadd.f32 %v2035_v24, %v1863_v46  ;;  %v2595_v28 = vpop.f32.mrb[51].mxu1 }
 0x927   : > { %2041 = vst.msk [vmem:[#allocation2] sm:$0xff] %vm528_vm1, %v2040_v27  ;;  %v2048_v29 = vsel (!%p2327_p1), %vm528_vm1, %v2040_v27, 0.0 }
 0x928   : > { %2049 = vadd.xlane.f32.xlu0 %v2048_v29 }
 0x9b5   : > { %v2050_v30 = vpop.xlane.xlu0 %2049 }
 0x9b6   : > { %v2051_v31 = vmul.f32 0.03125, %v2050_v30 }
 0x9b8   : > { %v2052_v17 = vsub.f32 %v2040_v27, %v2051_v31 }
 0x9ba   : > { %v2053_v32 = vmul.f32 %v2052_v17, %v2052_v17 }
 0x9bc   : > { %v2054_v19 = vsel %vm528_vm1, %v2053_v32, 0.0 }
 0x9bd   : > { %2055 = vadd.xlane.f32.xlu0 %v2054_v19 }
 0xa4a   : > { %v2056_v33 = vpop.xlane.xlu0 %2055 }
 0xa4b   : > { %v2057_v34 = vmul.f32 0.03125, %v2056_v33 }
 0xa4d   : > { %v2058_v35 = vadd.f32 1e-05, %v2057_v34 }
 0xa4f   : > { %2721 = vrsqrt.f32 %v2058_v35 }
 0xa59   : > { %v2722_v36 = vpop.eup %2721 }
 0xa5a   : > { %v2060_v38 = vmul.f32 %v2722_v36, %v2052_v17 }
 0xa5c   : > { %v2065_v40 = vmul.f32 %v2328_v37, %v2060_v38 }
 0xa5e   : > { %v2070_v41 = vadd.f32 %v2329_v39, %v2065_v40 }
 0xa60   : > { %2071 = vst.msk [vmem:[%s476_s4] sm:$0xff] %vm528_vm1, %v2070_v41 }
 0xa61 PF: > { %s2331_s26 = sshll.u32 %s2805_s17, 7  ;;  %s3346_s12 = sld [smem:[#allocation21_spill]] }
 0xa62   : > { %s2086_s28 = sshll.u32 %s476_s4, 4  ;;  %s3347_s18 = sand.u32 1, %s2793_s14   ;;  %s2087_s28 = int_to_ptr.vmem [resolvable:$true] %s2086_s28 }
 0xa63   : > { %s2073_s19 = scalar_lea.sflag [#allocation4], %s3347_s18  ;;  %s2723_s15 = scalar_lea.vmem %s2087_s28, 128 }
 0xa64   : > { %p2724_p2 = scmp.ne.s32.totalorder %s2087_s28, %s2723_s15  ;;  %s2821_s29 = smov [#allocation3]  }
 0xa65   : > { %s2727_s13 = sshll.u32 %s2821_s29, 4  ;;  %s2728_s13 = int_to_ptr.vmem [resolvable:$false] %s2727_s13 }
 0xa66   : > { %p2725_p4 = pnand %p2724_p2, %p2926_p3  ;;  %s2729_s20 = scalar_lea.vmem %s2728_s13, 256 }
 0xa67   : > { %s3248_s22 = scalar_lea.hbm %s3346_s12, %s2331_s26  ;;  %p2730_p6 = scmp.lt.s32.totalorder %s2087_s28, %s2728_s13 }
 0xa68   : > { %p2726_p5 = pneg %p2725_p4  ;;  %p2731_p7 = scmp.lt.s32.totalorder %s2729_s20, %s2723_s15 }
 0xa6a   : > { %p2732_p8 = por %p2731_p7, %p2730_p6 }
 0xa6c   : > { %p2733_p10 = pnand %p2732_p8, %p2726_p5 }
 0xa6e   : > { %2736 = shalt.err (!%p2733_p10)
}
 0xa6f   : > { %s2737_s4 = scalar_lea.hbm %s3248_s22, 128  ;;  %s2741_s23 = scalar_lea.hbm %s3346_s12, 256 }
 0xa70   : > { %p2738_p11 = scmp.ne.s32.totalorder %s3248_s22, %s2737_s4  ;;  %p2742_p0 = scmp.lt.u32.totalorder %s3248_s22, %s3346_s12 }
 0xa71   : > { %p2743_p1 = scmp.lt.u32.totalorder %s2741_s23, %s2737_s4  ;;  %p2745_p4 = scmp.lt.u32.totalorder %s2737_s4, %s3248_s22 }
 0xa72   : > { %p2739_p12 = pnand %p2738_p11, %p2926_p3 }
 0xa73   : > { %p2744_p2 = por %p2743_p1, %p2742_p0 }
 0xa74   : > { %p2740_p13 = pneg %p2739_p12 }
 0xa75   : > { %p2746_p5 = por %p2745_p4, %p2744_p2 }
 0xa77   : > { %p2747_p6 = pnand %p2746_p5, %p2740_p13 }
 0xa79   : > { %2750 = shalt.err (!%p2747_p6)
}
 0xa7a   : > { %2596 = dma.vmem_to_hbm [thread:$0]  (%p2926_p3), %s2087_s28, 128, %s3248_s22, %s2073_s19  }
 0xa7b PF: > { %s3348_s0 = sld [smem:[#allocation10_spill]]  ;;  %s3349_s1 = sld [smem:[#allocation6_spill]] }
 0xa81   : > { %p2602_p7 = scmp.ge.s32.totalorder %s3348_s0, 2  ;;  %s2098_s3 = sand.u32 1, %s3349_s1  }
 0xa82   : > { %s2099_s10 = scalar_lea.sflag [#allocation4], %s2098_s3 }
 0xa83   : > { %p2599_p8 = pnand %p2602_p7, %p2936_p9 }
 0xa85   : > { %2784 = dma.done.wait (!%p2599_p8), %s2099_s10, 128  }
 0xa86   : > { %2786 = vsyncadd (!%p2599_p8), %s2099_s10, 4294967168  ;;  %s23_s20 = sadd.s32 1, %s3348_s0   ;;  %s3351_s16 = sld [smem:[#allocation7_spill]] }
 0xa87   : > { %p20_p10 = scmp.ge.s32.totalorder %s23_s20, 6   ;;  %s3352_s15 = sld [smem:[#allocation15_spill]] }
 0xa88   : > { %s3353_s24 = sld [smem:[#allocation8_spill]]  ;;  %s3354_s17 = sld [smem:[#allocation9_spill]] }
 0xa89   : > { %s3355_s18 = sld [smem:[#allocation11_spill]]  ;;  %s3356_s19 = sld [smem:[#allocation13_spill]] }
 0xa8a   : > { %s3357_s13 = smov %s2793_s14  ;;  %22 = sbr.rel (!%p20_p10) target bundleno = 12 (0xc), region = 127 }
 0xa8c   : > { %s3358_s14 = smov %s3351_s16 }
 0xa8e   : > { %s3359_s16 = smov %s3353_s24 }
 0xa91   :  { %2104 = vsyncpa [#allocation4], 1 }
 0xa92   :  { %2106 = vsyncpa [#allocation4 + $0x1], 1 }

</bundles_post_ra>
